<compile_context>
chip_gen: v6e
topology: v6e:2x2x1
jax: 0.10.0
libtpu: 0.0.40
codegen_flags: <defaults>
</compile_context>

<pallas_src>
import functools
import math

import jax
import jax.numpy as jnp
from jax import lax
from jax.experimental import pallas as pl
from jax.experimental.pallas import tpu as pltpu


def _sdpa_kernel(q_ref, k_ref, v_ref, o_ref, m_sc, l_sc, acc_sc, *, scale):
    kv = pl.program_id(2)

    @pl.when(kv == 0)
    def _():
        m_sc[...] = jnp.full_like(m_sc, -jnp.inf)
        l_sc[...] = jnp.zeros_like(l_sc)
        acc_sc[...] = jnp.zeros_like(acc_sc)

    # Fold 1/sqrt(D) into q once (tq*D VPU mults) instead of scaling the
    # (tq, tk) score matrix each kv step.  Weak-typed python float keeps dtype.
    q = q_ref[0] * scale          # (tq, D)
    k = k_ref[0]                  # (tk, D)
    v = v_ref[0]                  # (tk, D)

    # scores (tq, tk): contract the head dim of both operands directly,
    # no explicit transpose of k.
    s = lax.dot_general(
        q, k,
        dimension_numbers=(((1,), (1,)), ((), ())),
        preferred_element_type=jnp.float32,
    )

    m_prev = m_sc[...]
    m_new = jnp.maximum(m_prev, s.max(axis=-1, keepdims=True))
    alpha = jnp.exp(m_prev - m_new)
    p = jnp.exp(s - m_new)

    l_sc[...] = alpha * l_sc[...] + p.sum(axis=-1, keepdims=True)
    acc_sc[...] = alpha * acc_sc[...] + jnp.dot(
        p.astype(v.dtype), v, preferred_element_type=jnp.float32
    )
    m_sc[...] = m_new

    @pl.when(kv == pl.num_programs(2) - 1)
    def _():
        o_ref[0] = (acc_sc[...] * pl.reciprocal(l_sc[...], approx=True)).astype(
            o_ref.dtype
        )


def _pick_tile(s, pref):
    """Largest tile <= pref that divides s (multiple of 8); else the full axis."""
    if s <= pref:
        return s
    t = (pref // 8) * 8
    while t >= 8:
        if s % t == 0:
            return t
        t -= 8
    return s  # block == full array dim is always legal


def scaled_dot_product_attention(query, key, value, *, tq=256, tk=1024):
    """Pallas equivalent of F.scaled_dot_product_attention (no mask, no dropout).

    query: [B, H, Sq, D], key/value: [B, H, Sk, D]  ->  output: [B, H, Sq, D]

    For peak MXU throughput on v6e/v7x pass bf16 inputs (accumulation is f32
    inside the kernel either way).
    """
    B, H, Sq, D = query.shape
    Sk = key.shape[2]
    assert key.shape == (B, H, Sk, D) and value.shape == (B, H, Sk, D)

    tq = _pick_tile(Sq, tq)
    tk = _pick_tile(Sk, tk)

    q = query.reshape(B * H, Sq, D)
    k = key.reshape(B * H, Sk, D)
    v = value.reshape(B * H, Sk, D)

    grid = (B * H, Sq // tq, Sk // tk)
    scale = 1.0 / math.sqrt(D)

    kernel = functools.partial(_sdpa_kernel, scale=scale)

    out = pl.pallas_call(
        kernel,
        out_shape=jax.ShapeDtypeStruct((B * H, Sq, D), query.dtype),
        grid_spec=pltpu.PrefetchScalarGridSpec(
            num_scalar_prefetch=0,
            grid=grid,
            in_specs=[
                pl.BlockSpec((1, tq, D), lambda b, qi, ki: (b, qi, 0)),
                pl.BlockSpec((1, tk, D), lambda b, qi, ki: (b, ki, 0)),
                pl.BlockSpec((1, tk, D), lambda b, qi, ki: (b, ki, 0)),
            ],
            out_specs=pl.BlockSpec((1, tq, D), lambda b, qi, ki: (b, qi, 0)),
            scratch_shapes=[
                pltpu.VMEM((tq, 1), jnp.float32),   # running max
                pltpu.VMEM((tq, 1), jnp.float32),   # running denom
                pltpu.VMEM((tq, D), jnp.float32),   # output accumulator
            ],
        ),
        compiler_params=pltpu.CompilerParams(
            dimension_semantics=("parallel", "parallel", "arbitrary"),
            vmem_limit_bytes=64 * 1024 * 1024,
        ),
    )(q, k, v)

    return out.reshape(B, H, Sq, D)


def attention_forward(query, key, value):
    """Forward pass of the `Attention` nn.Module."""
    return scaled_dot_product_attention(query, key, value)


def _reference_sdpa(query, key, value):
    D = query.shape[-1]
    s = jnp.einsum("bhqd,bhkd->bhqk", query.astype(jnp.float32),
                   key.astype(jnp.float32)) / math.sqrt(D)
    p = jax.nn.softmax(s, axis=-1)
    return jnp.einsum("bhqk,bhkd->bhqd", p, value.astype(jnp.float32)).astype(
        query.dtype
    )


if __name__ == "__main__":
    # Small, deterministic inputs: batch=2, heads=2, Sq=128, Sk=256, head_dim=64
    key0 = jax.random.PRNGKey(0)
    kq, kk, kv = jax.random.split(key0, 3)
    B, H, Sq, Sk, D = 2, 2, 128, 256, 64
    q = jax.random.normal(kq, (B, H, Sq, D), dtype=jnp.float32)
    k = jax.random.normal(kk, (B, H, Sk, D), dtype=jnp.float32)
    v = jax.random.normal(kv, (B, H, Sk, D), dtype=jnp.float32)

    ref = _reference_sdpa(q, k, v)

    # Default large tiles: the kv axis collapses (tk == Sk), single pass.
    out = jax.block_until_ready(attention_forward(q, k, v))
    assert out.shape == (B, H, Sq, D)
    assert jnp.max(jnp.abs(out - ref)) < 2e-3

    # Small tiles: exercises the multi-step online-softmax reduction path.
    out2 = jax.block_until_ready(
        scaled_dot_product_attention(q, k, v, tq=64, tk=64)
    )
    assert jnp.max(jnp.abs(out2 - ref)) < 2e-3

    print("KERNEL_OK")
</pallas_src>

<mosaic_0001>
module attributes {stable_mosaic.version = 11 : i64} {
  func.func @_sdpa_kernel(%arg0: i32, %arg1: i32, %arg2: i32, %arg3: memref<1x128x64xf32, #tpu.memory_space<vmem>>, %arg4: memref<1x256x64xf32, #tpu.memory_space<vmem>>, %arg5: memref<1x256x64xf32, #tpu.memory_space<vmem>>, %arg6: memref<1x128x64xf32, #tpu.memory_space<vmem>>, %arg7: memref<128x1xf32, #tpu.memory_space<vmem>>, %arg8: memref<128x1xf32, #tpu.memory_space<vmem>>, %arg9: memref<128x64xf32, #tpu.memory_space<vmem>>) attributes {dimension_semantics = [#tpu.dimension_semantics<parallel>, #tpu.dimension_semantics<parallel>, #tpu.dimension_semantics<arbitrary>], iteration_bounds = array<i64: 4, 1, 1>, scalar_prefetch = 0 : i64, scratch_operands = 3 : i64, tpu.core_type = #tpu.core_type<tc>, window_params = [{transform_indices = @transform_0, window_bounds = array<i64: 1, 128, 64>}, {transform_indices = @transform_1, window_bounds = array<i64: 1, 256, 64>}, {transform_indices = @transform_2, window_bounds = array<i64: 1, 256, 64>}, {transform_indices = @transform_3, window_bounds = array<i64: 1, 128, 64>}]} {
    %c0_i32 = arith.constant 0 : i32
    %0 = arith.cmpi eq, %arg2, %c0_i32 : i32
    %1 = arith.extui %0 : i1 to i32
    %c0_i32_0 = arith.constant 0 : i32
    %2 = arith.cmpi ne, %1, %c0_i32_0 : i32
    scf.if %2 {
      %cst_27 = arith.constant 0xFF800000 : f32
      %37 = vector.broadcast %cst_27 : f32 to vector<128x1xf32>
      %c0_28 = arith.constant 0 : index
      %c0_29 = arith.constant 0 : index
      %38 = vector.load %arg7[%c0_28, %c0_29] : memref<128x1xf32, #tpu.memory_space<vmem>>, vector<128x1xf32>
      tpu.vector_store %arg7[%c0_28, %c0_29], %37 {strides = array<i32>} : memref<128x1xf32, #tpu.memory_space<vmem>>, vector<128x1xf32>,
      %cst_30 = arith.constant 0.000000e+00 : f32
      %39 = vector.broadcast %cst_30 : f32 to vector<128x1xf32>
      %c0_31 = arith.constant 0 : index
      %c0_32 = arith.constant 0 : index
      %40 = vector.load %arg8[%c0_31, %c0_32] : memref<128x1xf32, #tpu.memory_space<vmem>>, vector<128x1xf32>
      tpu.vector_store %arg8[%c0_31, %c0_32], %39 {strides = array<i32>} : memref<128x1xf32, #tpu.memory_space<vmem>>, vector<128x1xf32>,
      %cst_33 = arith.constant 0.000000e+00 : f32
      %41 = vector.broadcast %cst_33 : f32 to vector<128x64xf32>
      %c0_34 = arith.constant 0 : index
      %c0_35 = arith.constant 0 : index
      %42 = vector.load %arg9[%c0_34, %c0_35] : memref<128x64xf32, #tpu.memory_space<vmem>>, vector<128x64xf32>
      tpu.vector_store %arg9[%c0_34, %c0_35], %41 {strides = array<i32>} : memref<128x64xf32, #tpu.memory_space<vmem>>, vector<128x64xf32>,
    } else {
    }
    %c0 = arith.constant 0 : index
    %c0_1 = arith.constant 0 : index
    %c0_2 = arith.constant 0 : index
    %3 = vector.load %arg3[%c0, %c0_1, %c0_2] : memref<1x128x64xf32, #tpu.memory_space<vmem>>, vector<1x128x64xf32>
    %4 = vector.shape_cast %3 : vector<1x128x64xf32> to vector<128x64xf32>
    %cst = arith.constant 1.250000e-01 : f32
    %5 = vector.broadcast %cst : f32 to vector<128x64xf32>
    %6 = arith.mulf %4, %5 : vector<128x64xf32>
    %c0_3 = arith.constant 0 : index
    %c0_4 = arith.constant 0 : index
    %c0_5 = arith.constant 0 : index
    %7 = vector.load %arg4[%c0_3, %c0_4, %c0_5] : memref<1x256x64xf32, #tpu.memory_space<vmem>>, vector<1x256x64xf32>
    %8 = vector.shape_cast %7 : vector<1x256x64xf32> to vector<256x64xf32>
    %c0_6 = arith.constant 0 : index
    %c0_7 = arith.constant 0 : index
    %c0_8 = arith.constant 0 : index
    %9 = vector.load %arg5[%c0_6, %c0_7, %c0_8] : memref<1x256x64xf32, #tpu.memory_space<vmem>>, vector<1x256x64xf32>
    %10 = vector.shape_cast %9 : vector<1x256x64xf32> to vector<256x64xf32>
    %cst_9 = arith.constant dense<0.000000e+00> : vector<128x256xf32>
    %11 = tpu.matmul %6, %8, %cst_9 {dimension_numbers = #tpu.dot_dimension_numbers<[1], [1], [0], [0], [0, 0, 1, 0], [], []>} : vector<128x64xf32>, vector<256x64xf32>, vector<128x256xf32> -> vector<128x256xf32>
    %c0_10 = arith.constant 0 : index
    %c0_11 = arith.constant 0 : index
    %12 = vector.load %arg7[%c0_10, %c0_11] : memref<128x1xf32, #tpu.memory_space<vmem>>, vector<128x1xf32>
    %cst_12 = arith.constant dense<0xFF800000> : vector<128xf32>
    %13 = vector.multi_reduction <maximumf>, %11, %cst_12 [1] : vector<128x256xf32> to vector<128xf32>
    %14 = vector.shape_cast %13 : vector<128xf32> to vector<128x1xf32>
    %15 = arith.maximumf %12, %14 : vector<128x1xf32>
    %16 = arith.subf %12, %15 : vector<128x1xf32>
    %17 = math.exp %16 : vector<128x1xf32>
    %18 = vector.broadcast %15 : vector<128x1xf32> to vector<128x256xf32>
    %19 = arith.subf %11, %18 : vector<128x256xf32>
    %20 = math.exp %19 : vector<128x256xf32>
    %c0_13 = arith.constant 0 : index
    %c0_14 = arith.constant 0 : index
    %21 = vector.load %arg8[%c0_13, %c0_14] : memref<128x1xf32, #tpu.memory_space<vmem>>, vector<128x1xf32>
    %22 = arith.mulf %17, %21 : vector<128x1xf32>
    %cst_15 = arith.constant dense<0.000000e+00> : vector<128xf32>
    %23 = vector.multi_reduction <add>, %20, %cst_15 [1] : vector<128x256xf32> to vector<128xf32>
    %24 = vector.shape_cast %23 : vector<128xf32> to vector<128x1xf32>
    %25 = arith.addf %22, %24 : vector<128x1xf32>
    %c0_16 = arith.constant 0 : index
    %c0_17 = arith.constant 0 : index
    %26 = vector.load %arg8[%c0_16, %c0_17] : memref<128x1xf32, #tpu.memory_space<vmem>>, vector<128x1xf32>
    tpu.vector_store %arg8[%c0_16, %c0_17], %25 {strides = array<i32>} : memref<128x1xf32, #tpu.memory_space<vmem>>, vector<128x1xf32>,
    %c0_18 = arith.constant 0 : index
    %c0_19 = arith.constant 0 : index
    %27 = vector.load %arg9[%c0_18, %c0_19] : memref<128x64xf32, #tpu.memory_space<vmem>>, vector<128x64xf32>
    %28 = vector.broadcast %17 : vector<128x1xf32> to vector<128x64xf32>
    %29 = arith.mulf %28, %27 : vector<128x64xf32>
    %cst_20 = arith.constant dense<0.000000e+00> : vector<128x64xf32>
    %30 = tpu.matmul %20, %10, %cst_20 {dimension_numbers = #tpu.dot_dimension_numbers<[1], [0], [0], [1], [0, 0, 1, 1], [], []>} : vector<128x256xf32>, vector<256x64xf32>, vector<128x64xf32> -> vector<128x64xf32>
    %31 = arith.addf %29, %30 : vector<128x64xf32>
    %c0_21 = arith.constant 0 : index
    %c0_22 = arith.constant 0 : index
    %32 = vector.load %arg9[%c0_21, %c0_22] : memref<128x64xf32, #tpu.memory_space<vmem>>, vector<128x64xf32>
    tpu.vector_store %arg9[%c0_21, %c0_22], %31 {strides = array<i32>} : memref<128x64xf32, #tpu.memory_space<vmem>>, vector<128x64xf32>,
    %c0_23 = arith.constant 0 : index
    %c0_24 = arith.constant 0 : index
    %33 = vector.load %arg7[%c0_23, %c0_24] : memref<128x1xf32, #tpu.memory_space<vmem>>, vector<128x1xf32>
    tpu.vector_store %arg7[%c0_23, %c0_24], %15 {strides = array<i32>} : memref<128x1xf32, #tpu.memory_space<vmem>>, vector<128x1xf32>,
    %c0_i32_25 = arith.constant 0 : i32
    %34 = arith.cmpi eq, %arg2, %c0_i32_25 : i32
    %35 = arith.extui %34 : i1 to i32
    %c0_i32_26 = arith.constant 0 : i32
    %36 = arith.cmpi ne, %35, %c0_i32_26 : i32
    scf.if %36 {
      %c0_27 = arith.constant 0 : index
      %c0_28 = arith.constant 0 : index
      %37 = vector.load %arg9[%c0_27, %c0_28] : memref<128x64xf32, #tpu.memory_space<vmem>>, vector<128x64xf32>
      %c0_29 = arith.constant 0 : index
      %c0_30 = arith.constant 0 : index
      %38 = vector.load %arg8[%c0_29, %c0_30] : memref<128x1xf32, #tpu.memory_space<vmem>>, vector<128x1xf32>
      %39 = tpu.reciprocal %38 {approx = true} : vector<128x1xf32> -> vector<128x1xf32>
      %40 = vector.broadcast %39 : vector<128x1xf32> to vector<128x64xf32>
      %41 = arith.mulf %37, %40 : vector<128x64xf32>
      %c0_31 = arith.constant 0 : index
      %c0_32 = arith.constant 0 : index
      %c0_33 = arith.constant 0 : index
      %42 = vector.load %arg6[%c0_31, %c0_32, %c0_33] : memref<1x128x64xf32, #tpu.memory_space<vmem>>, vector<1x128x64xf32>
      %43 = vector.shape_cast %42 : vector<1x128x64xf32> to vector<128x64xf32>
      %44 = vector.shape_cast %41 : vector<128x64xf32> to vector<1x128x64xf32>
      tpu.vector_store %arg6[%c0_31, %c0_32, %c0_33], %44 {strides = array<i32>} : memref<1x128x64xf32, #tpu.memory_space<vmem>>, vector<1x128x64xf32>,
    } else {
    }
    return
  }
  func.func @transform_0(%arg0: i32, %arg1: i32, %arg2: i32) -> (i32, i32, i32) {
    %c0_i32 = arith.constant 0 : i32
    %c0_i32_0 = arith.constant 0 : i32
    return %arg0, %arg1, %c0_i32 : i32, i32, i32
  }
  func.func @transform_1(%arg0: i32, %arg1: i32, %arg2: i32) -> (i32, i32, i32) {
    %c0_i32 = arith.constant 0 : i32
    %c0_i32_0 = arith.constant 0 : i32
    return %arg0, %arg2, %c0_i32 : i32, i32, i32
  }
  func.func @transform_2(%arg0: i32, %arg1: i32, %arg2: i32) -> (i32, i32, i32) {
    %c0_i32 = arith.constant 0 : i32
    %c0_i32_0 = arith.constant 0 : i32
    return %arg0, %arg2, %c0_i32 : i32, i32, i32
  }
  func.func @transform_3(%arg0: i32, %arg1: i32, %arg2: i32) -> (i32, i32, i32) {
    %c0_i32 = arith.constant 0 : i32
    %c0_i32_0 = arith.constant 0 : i32
    return %arg0, %arg1, %c0_i32 : i32, i32, i32
  }
}

</mosaic_0001>

<bundles_post_ra>
// kernel: tpu_custom_call.1
= control target key start
LH: loop header
LB: loop body
LE: loop exit
PB: predicated region body
PF: predicated region fallthrough
CT: control target
= control target key end

     0   :  { %s2171_s12 = smov 0   ;;  %s2173_s13 = smov 0   ;;  %s2858_s0 = inlined_call_operand.vmem [shape: f32[4,128,64], index: 0, kind: input, shape index: {}]   ;;  %s2859_s1 = inlined_call_operand.vmem [shape: f32[4,256,64], index: 1, kind: input, shape index: {}]   ;;  %s2860_s2 = inlined_call_operand.vmem [shape: f32[4,256,64], index: 2, kind: input, shape index: {}]   ;;  %s2861_s3 = inlined_call_operand.vmem [shape: f32[4,128,64], index: 3, kind: output, shape index: {}]  }
   0x1   :  { %s2175_s14 = smov 0  }
   0x2 LB: > { %s32_s15 = sadd.s32 1, %s2142_s13  ;;  %p1760_p0 = scmp.ge.s32.totalorder %s2146_s14, 1  ;;  %s2146_s14 = sphi %s2175_s14, %s13_s14   ;;  %s2142_s13 = sphi %s2173_s13, %s2918_s13   ;;  %s2138_s12 = sphi %s2171_s12, %s2917_s12  }
   0x3   : > { %p34_p1 = scmp.ge.s32.totalorder %s32_s15, 4  ;;  %p199_p2 = scmp.lt.s32.totalorder %s2146_s14, 5 }
   0x5   : > { %s2920_s15 = smov (%p34_p1, %s32_s15), 0  ;;  %p200_p3 = pnand %p1760_p0, %p199_p2 }
   0x7   : > { %203 = sbr.rel (%p200_p3) target bundleno = 914 (0x392), region = 32 }
   0xc   : > { %p250_p4 = scmp.lt.s32.totalorder %s2138_s12, 3  ;;  %vm326_vm0 = vcmask 523264   ;;  %vm293_vm1 = vcmask 7168  }
   0xe   : > { %s2922_s12 = smov (!%p250_p4, %s2138_s12), 3 }
   0xf   : > { %s1820_s16 = sshll.u32 %s2922_s12, 8  ;;  %s1819_s20 = sshll.u32 %s2922_s12, 7 }
  0x10   : > { %s2197_s19 = scalar_lea.vmem %s2859_s1, %s1820_s16  ;;  %s2216_s23 = scalar_lea.vmem %s2858_s0, %s1819_s20 }
  0x11   : > { %v406_v0 = vld [vmem:[%s2197_s19 + $0xf8] sm:$0xff]  ;;  %v405_v2 = vld [vmem:[%s2197_s19 + $0xf0] sm:$0xff]  ;;  %v404_v4 = vld [vmem:[%s2197_s19 + $0xe8] sm:$0xff]  ;;  %s2468_s26 = scalar_lea.vmem %s2860_s2, %s1820_s16  ;;  %s2815_s29 = scalar_lea.vmem %s2861_s3, %s1819_s20 }
  0x12   : > { %v390_v1 = vld [vmem:[%s2197_s19 + $0x78] sm:$0xff]  ;;  %1823 = vmatprep.subr.msk.mxu0 %vm326_vm0, %v406_v0  ;;  %v389_v3 = vld [vmem:[%s2197_s19 + $0x70] sm:$0xff]  ;;  %v388_v5 = vld [vmem:[%s2197_s19 + $0x68] sm:$0xff]  ;;  %v2148_v0 = vmov -inf  }
  0x13   : > { %1824 = vmatpush3.xpose.msk.msra.mxu0 %vm326_vm0, %v390_v1  ;;  %v403_v6 = vld [vmem:[%s2197_s19 + $0xe0] sm:$0xff]  ;;  %v402_v10 = vld [vmem:[%s2197_s19 + $0xd8] sm:$0xff]  ;;  %v401_v12 = vld [vmem:[%s2197_s19 + $0xd0] sm:$0xff]  ;;  %294 = vst.msk [vmem:[#allocation2] sm:$0xff] %vm293_vm1, %v2148_v0 }
  0x14   : > { %1825 = vmatprep.subr.msk.mxu0 %vm326_vm0, %v405_v2  ;;  %v343_v7 = vld [vmem:[%s2216_s23] sm:$0xff]  ;;  %v386_v11 = vld [vmem:[%s2197_s19 + $0x58] sm:$0xff]  ;;  %v385_v13 = vld [vmem:[%s2197_s19 + $0x50] sm:$0xff]  ;;  %295 = vst.msk [vmem:[#allocation2 + $0x8] sm:$0xff] %vm293_vm1, %v2148_v0 }
  0x15   : > { %v387_v8 = vld [vmem:[%s2197_s19 + $0x60] sm:$0xff]  ;;  %v359_v9 = vmul.f32 0.125, %v343_v7  ;;  %v400_v14 = vld [vmem:[%s2197_s19 + $0xc8] sm:$0xff]  ;;  %v398_v18 = vld [vmem:[%s2197_s19 + $0xb8] sm:$0xff]  ;;  %296 = vst.msk [vmem:[#allocation2 + $0x10] sm:$0xff] %vm293_vm1, %v2148_v0 }
  0x16   : > { %v384_v15 = vld [vmem:[%s2197_s19 + $0x48] sm:$0xff]  ;;  %v399_v16 = vld [vmem:[%s2197_s19 + $0xc0] sm:$0xff]  ;;  %v382_v19 = vld [vmem:[%s2197_s19 + $0x38] sm:$0xff]  ;;  %297 = vst.msk [vmem:[#allocation2 + $0x18] sm:$0xff] %vm293_vm1, %v2148_v0 }
  0x17   : > { %1826 = vmatpush3.xpose.msk.msra.mxu0 %vm326_vm0, %v389_v3  ;;  %1855 = vmatprep.mubr.msk.f32.mxu0 %vm326_vm0, %v359_v9  ;;  %v383_v17 = vld [vmem:[%s2197_s19 + $0x40] sm:$0xff]  ;;  %v397_v20 = vld [vmem:[%s2197_s19 + $0xb0] sm:$0xff]  ;;  %v396_v22 = vld [vmem:[%s2197_s19 + $0xa8] sm:$0xff]  ;;  %298 = vst.msk [vmem:[#allocation2 + $0x20] sm:$0xff] %vm293_vm1, %v2148_v0 }
  0x18   : > { %1827 = vmatprep.subr.msk.mxu0 %vm326_vm0, %v404_v4  ;;  %v381_v21 = vld [vmem:[%s2197_s19 + $0x30] sm:$0xff]  ;;  %v380_v23 = vld [vmem:[%s2197_s19 + $0x28] sm:$0xff]  ;;  %v395_v24 = vld [vmem:[%s2197_s19 + $0xa0] sm:$0xff]  ;;  %299 = vst.msk [vmem:[#allocation2 + $0x28] sm:$0xff] %vm293_vm1, %v2148_v0 }
  0x19   : > { %v379_v25 = vld [vmem:[%s2197_s19 + $0x20] sm:$0xff]  ;;  %v394_v26 = vld [vmem:[%s2197_s19 + $0x98] sm:$0xff]  ;;  %v393_v28 = vld [vmem:[%s2197_s19 + $0x90] sm:$0xff]  ;;  %300 = vst.msk [vmem:[#allocation2 + $0x30] sm:$0xff] %vm293_vm1, %v2148_v0 }
  0x1a   : > { %v378_v27 = vld [vmem:[%s2197_s19 + $0x18] sm:$0xff]  ;;  %v377_v29 = vld [vmem:[%s2197_s19 + $0x10] sm:$0xff]  ;;  %v392_v30 = vld [vmem:[%s2197_s19 + $0x88] sm:$0xff]  ;;  %301 = vst.msk [vmem:[#allocation2 + $0x38] sm:$0xff] %vm293_vm1, %v2148_v0 }
  0x1b   : > { %1828 = vmatpush3.xpose.msk.msra.mxu0 %vm326_vm0, %v388_v5  ;;  %v376_v31 = vld [vmem:[%s2197_s19 + $0x8] sm:$0xff]  ;;  %v391_v32 = vld [vmem:[%s2197_s19 + $0x80] sm:$0xff]  ;;  %v345_v36 = vld [vmem:[%s2216_s23 + $0x10] sm:$0xff]  ;;  %302 = vst.msk [vmem:[#allocation2 + $0x40] sm:$0xff] %vm293_vm1, %v2148_v0 }
  0x1c   : > { %1829 = vmatprep.subr.msk.mxu0 %vm326_vm0, %v403_v6  ;;  %v375_v33 = vld [vmem:[%s2197_s19] sm:$0xff]  ;;  %v344_v34 = vld [vmem:[%s2216_s23 + $0x8] sm:$0xff]  ;;  %v361_v37 = vmul.f32 0.125, %v345_v36  ;;  %v346_v38 = vld [vmem:[%s2216_s23 + $0x18] sm:$0xff]  ;;  %303 = vst.msk [vmem:[#allocation2 + $0x48] sm:$0xff] %vm293_vm1, %v2148_v0 }
  0x1d   : > { %v360_v35 = vmul.f32 0.125, %v344_v34  ;;  %v362_v39 = vmul.f32 0.125, %v346_v38  ;;  %v347_v40 = vld [vmem:[%s2216_s23 + $0x20] sm:$0xff]  ;;  %v348_v42 = vld [vmem:[%s2216_s23 + $0x28] sm:$0xff]  ;;  %v349_v44 = vld [vmem:[%s2216_s23 + $0x30] sm:$0xff]  ;;  %304 = vst.msk [vmem:[#allocation2 + $0x50] sm:$0xff] %vm293_vm1, %v2148_v0 }
  0x1e   : > { %v363_v41 = vmul.f32 0.125, %v347_v40  ;;  %v364_v43 = vmul.f32 0.125, %v348_v42  ;;  %v365_v45 = vmul.f32 0.125, %v349_v44  ;;  %v350_v46 = vld [vmem:[%s2216_s23 + $0x38] sm:$0xff]  ;;  %v351_v48 = vld [vmem:[%s2216_s23 + $0x40] sm:$0xff]  ;;  %v352_v50 = vld [vmem:[%s2216_s23 + $0x48] sm:$0xff] }
  0x1f   : > { %1830 = vmatpush3.xpose.msk.msra.mxu0 %vm326_vm0, %v387_v8  ;;  %v366_v47 = vmul.f32 0.125, %v350_v46  ;;  %v367_v49 = vmul.f32 0.125, %v351_v48  ;;  %v368_v51 = vmul.f32 0.125, %v352_v50  ;;  %v353_v52 = vld [vmem:[%s2216_s23 + $0x50] sm:$0xff]  ;;  %v354_v54 = vld [vmem:[%s2216_s23 + $0x58] sm:$0xff]  ;;  %v355_v56 = vld [vmem:[%s2216_s23 + $0x60] sm:$0xff] }
  0x20   : > { %1831 = vmatprep.subr.msk.mxu0 %vm326_vm0, %v402_v10  ;;  %v369_v53 = vmul.f32 0.125, %v353_v52  ;;  %v370_v55 = vmul.f32 0.125, %v354_v54  ;;  %v371_v57 = vmul.f32 0.125, %v355_v56  ;;  %v356_v58 = vld [vmem:[%s2216_s23 + $0x68] sm:$0xff]  ;;  %v357_v60 = vld [vmem:[%s2216_s23 + $0x70] sm:$0xff]  ;;  %v358_v62 = vld [vmem:[%s2216_s23 + $0x78] sm:$0xff] }
  0x21   : > { %v372_v59 = vmul.f32 0.125, %v356_v58  ;;  %v373_v61 = vmul.f32 0.125, %v357_v60  ;;  %v374_v63 = vmul.f32 0.125, %v358_v62  ;;  %305 = vst.msk [vmem:[#allocation2 + $0x58] sm:$0xff] %vm293_vm1, %v2148_v0  ;;  %306 = vst.msk [vmem:[#allocation2 + $0x60] sm:$0xff] %vm293_vm1, %v2148_v0  ;;  %v422_v52 = vld [vmem:[%s2468_s26 + $0x78] sm:$0xff] }
  0x22   : > { %307 = vst.msk [vmem:[#allocation2 + $0x68] sm:$0xff] %vm293_vm1, %v2148_v0  ;;  %308 = vst.msk [vmem:[#allocation2 + $0x70] sm:$0xff] %vm293_vm1, %v2148_v0  ;;  %v421_v54 = vld [vmem:[%s2468_s26 + $0x70] sm:$0xff]  ;;  %v420_v56 = vld [vmem:[%s2468_s26 + $0x68] sm:$0xff] }
  0x23   : > { %1832 = vmatpush3.xpose.msk.msra.mxu0 %vm326_vm0, %v386_v11  ;;  %309 = vst.msk [vmem:[#allocation2 + $0x78] sm:$0xff] %vm293_vm1, %v2148_v0  ;;  %v419_v58 = vld [vmem:[%s2468_s26 + $0x60] sm:$0xff]  ;;  %v418_v60 = vld [vmem:[%s2468_s26 + $0x58] sm:$0xff]  ;;  %v417_v62 = vld [vmem:[%s2468_s26 + $0x50] sm:$0xff] }
  0x24   : > { %1833 = vmatprep.subr.msk.mxu0 %vm326_vm0, %v401_v12  ;;  %v2483_v0 = vld [vmem:[#allocation2] sm:$0xff] }
  0x27   : > { %1834 = vmatpush3.xpose.msk.msra.mxu0 %vm326_vm0, %v385_v13 }
  0x28   : > { %1835 = vmatprep.subr.msk.mxu0 %vm326_vm0, %v400_v14  ;;  %v2149_v14 = vmov 0  }
  0x29   : > { %1994 = vset.pattern.permute.xlu0 %v2149_v14  ;;  %1995 = vset.pattern.permute.xlu1 %v2149_v14  ;;  %v415_v14 = vld [vmem:[%s2468_s26 + $0x40] sm:$0xff] }
  0x2b   : > { %1836 = vmatpush3.xpose.msk.msra.mxu0 %vm326_vm0, %v384_v15 }
  0x2c   : > { %1837 = vmatprep.subr.msk.mxu0 %vm326_vm0, %v399_v16 }
  0x2f   : > { %1838 = vmatpush3.xpose.msk.msra.mxu0 %vm326_vm0, %v383_v17 }
  0x30   : > { %1839 = vmatprep.subr.msk.mxu0 %vm326_vm0, %v398_v18 }
  0x33   : > { %1840 = vmatpush3.xpose.msk.msra.mxu0 %vm326_vm0, %v382_v19 }
  0x34   : > { %1841 = vmatprep.subr.msk.mxu0 %vm326_vm0, %v397_v20 }
  0x37   : > { %1842 = vmatpush3.xpose.msk.msra.mxu0 %vm326_vm0, %v381_v21 }
  0x38   : > { %1843 = vmatprep.subr.msk.mxu0 %vm326_vm0, %v396_v22 }
  0x3b   : > { %1844 = vmatpush3.xpose.msk.msra.mxu0 %vm326_vm0, %v380_v23 }
  0x3c   : > { %1845 = vmatprep.subr.msk.mxu0 %vm326_vm0, %v395_v24  ;;  %v2150_v24 = vmov 0.0  }
  0x3d   : > { %310 = vst.msk [vmem:[#allocation3] sm:$0xff] %vm293_vm1, %v2150_v24  ;;  %311 = vst.msk [vmem:[#allocation3 + $0x8] sm:$0xff] %vm293_vm1, %v2150_v24 }
  0x3e   : > { %312 = vst.msk [vmem:[#allocation3 + $0x10] sm:$0xff] %vm293_vm1, %v2150_v24  ;;  %313 = vst.msk [vmem:[#allocation3 + $0x18] sm:$0xff] %vm293_vm1, %v2150_v24 }
  0x3f   : > { %1846 = vmatpush3.xpose.msk.msra.mxu0 %vm326_vm0, %v379_v25  ;;  %314 = vst.msk [vmem:[#allocation3 + $0x20] sm:$0xff] %vm293_vm1, %v2150_v24  ;;  %315 = vst.msk [vmem:[#allocation3 + $0x28] sm:$0xff] %vm293_vm1, %v2150_v24 }
  0x40   : > { %1847 = vmatprep.subr.msk.mxu0 %vm326_vm0, %v394_v26  ;;  %316 = vst.msk [vmem:[#allocation3 + $0x30] sm:$0xff] %vm293_vm1, %v2150_v24  ;;  %317 = vst.msk [vmem:[#allocation3 + $0x38] sm:$0xff] %vm293_vm1, %v2150_v24 }
  0x41   : > { %318 = vst.msk [vmem:[#allocation3 + $0x40] sm:$0xff] %vm293_vm1, %v2150_v24  ;;  %319 = vst.msk [vmem:[#allocation3 + $0x48] sm:$0xff] %vm293_vm1, %v2150_v24 }
  0x42   : > { %320 = vst.msk [vmem:[#allocation3 + $0x50] sm:$0xff] %vm293_vm1, %v2150_v24  ;;  %321 = vst.msk [vmem:[#allocation3 + $0x58] sm:$0xff] %vm293_vm1, %v2150_v24 }
  0x43   : > { %1848 = vmatpush3.xpose.msk.msra.mxu0 %vm326_vm0, %v378_v27  ;;  %322 = vst.msk [vmem:[#allocation3 + $0x60] sm:$0xff] %vm293_vm1, %v2150_v24  ;;  %323 = vst.msk [vmem:[#allocation3 + $0x68] sm:$0xff] %vm293_vm1, %v2150_v24 }
  0x44   : > { %1849 = vmatprep.subr.msk.mxu0 %vm326_vm0, %v393_v28  ;;  %324 = vst.msk [vmem:[#allocation3 + $0x70] sm:$0xff] %vm293_vm1, %v2150_v24  ;;  %325 = vst.msk [vmem:[#allocation3 + $0x78] sm:$0xff] %vm293_vm1, %v2150_v24 }
  0x45   : > { %327 = vst.msk [vmem:[#allocation4] sm:$0xff] %vm326_vm0, %v2150_v24  ;;  %328 = vst.msk [vmem:[#allocation4 + $0x8] sm:$0xff] %vm326_vm0, %v2150_v24 }
  0x46   : > { %329 = vst.msk [vmem:[#allocation4 + $0x10] sm:$0xff] %vm326_vm0, %v2150_v24  ;;  %330 = vst.msk [vmem:[#allocation4 + $0x18] sm:$0xff] %vm326_vm0, %v2150_v24 }
  0x47   : > { %1850 = vmatpush3.xpose.msk.msra.mxu0 %vm326_vm0, %v377_v29  ;;  %331 = vst.msk [vmem:[#allocation4 + $0x20] sm:$0xff] %vm326_vm0, %v2150_v24  ;;  %332 = vst.msk [vmem:[#allocation4 + $0x28] sm:$0xff] %vm326_vm0, %v2150_v24 }
  0x48   : > { %1851 = vmatprep.subr.msk.mxu0 %vm326_vm0, %v392_v30  ;;  %333 = vst.msk [vmem:[#allocation4 + $0x30] sm:$0xff] %vm326_vm0, %v2150_v24  ;;  %334 = vst.msk [vmem:[#allocation4 + $0x38] sm:$0xff] %vm326_vm0, %v2150_v24 }
  0x49   : > { %335 = vst.msk [vmem:[#allocation4 + $0x40] sm:$0xff] %vm326_vm0, %v2150_v24  ;;  %336 = vst.msk [vmem:[#allocation4 + $0x48] sm:$0xff] %vm326_vm0, %v2150_v24 }
  0x4a   : > { %337 = vst.msk [vmem:[#allocation4 + $0x50] sm:$0xff] %vm326_vm0, %v2150_v24  ;;  %338 = vst.msk [vmem:[#allocation4 + $0x58] sm:$0xff] %vm326_vm0, %v2150_v24 }
  0x4b   : > { %1852 = vmatpush3.xpose.msk.msra.mxu0 %vm326_vm0, %v376_v31  ;;  %339 = vst.msk [vmem:[#allocation4 + $0x60] sm:$0xff] %vm326_vm0, %v2150_v24  ;;  %340 = vst.msk [vmem:[#allocation4 + $0x68] sm:$0xff] %vm326_vm0, %v2150_v24 }
  0x4c   : > { %1853 = vmatprep.subr.msk.mxu0 %vm326_vm0, %v391_v32  ;;  %341 = vst.msk [vmem:[#allocation4 + $0x70] sm:$0xff] %vm326_vm0, %v2150_v24  ;;  %342 = vst.msk [vmem:[#allocation4 + $0x78] sm:$0xff] %vm326_vm0, %v2150_v24  ;;  %v414_v24 = vld [vmem:[%s2468_s26 + $0x38] sm:$0xff] }
  0x4f   : > { %1854 = vmatpush3.xpose.msk.msra.mxu0 %vm326_vm0, %v375_v33 }
  0x52   : > { %1856 = vmatmul.mubr.msk.f32.vlgmr.msra.gmra.mxu0 %vm326_vm0, %v359_v9 }
  0x53   : > { %1857 = vmatprep.mubr.msk.f32.mxu0 %vm326_vm0, %v360_v35 }
  0x56   : > { %1858 = vmatmul.mubr.msk.f32.gmra.mxu0 %vm326_vm0, %v360_v35 }
  0x57   : > { %1859 = vmatprep.mubr.msk.f32.mxu0 %vm326_vm0, %v361_v37 }
  0x5a   : > { %1860 = vmatmul.mubr.msk.f32.gmra.mxu0 %vm326_vm0, %v361_v37 }
  0x5b   : > { %1861 = vmatprep.mubr.msk.f32.mxu0 %vm326_vm0, %v362_v39 }
  0x5e   : > { %1862 = vmatmul.mubr.msk.f32.gmra.mxu0 %vm326_vm0, %v362_v39 }
  0x5f   : > { %1863 = vmatprep.mubr.msk.f32.mxu0 %vm326_vm0, %v363_v41 }
  0x62   : > { %1864 = vmatmul.mubr.msk.f32.gmra.mxu0 %vm326_vm0, %v363_v41 }
  0x63   : > { %1865 = vmatprep.mubr.msk.f32.mxu0 %vm326_vm0, %v364_v43 }
  0x66   : > { %1866 = vmatmul.mubr.msk.f32.gmra.mxu0 %vm326_vm0, %v364_v43 }
  0x67   : > { %1867 = vmatprep.mubr.msk.f32.mxu0 %vm326_vm0, %v365_v45 }
  0x6a   : > { %1868 = vmatmul.mubr.msk.f32.gmra.mxu0 %vm326_vm0, %v365_v45 }
  0x6b   : > { %1869 = vmatprep.mubr.msk.f32.mxu0 %vm326_vm0, %v366_v47 }
  0x6e   : > { %1870 = vmatmul.mubr.msk.f32.gmra.mxu0 %vm326_vm0, %v366_v47 }
  0x6f   : > { %1871 = vmatprep.mubr.msk.f32.mxu0 %vm326_vm0, %v367_v49 }
  0x72   : > { %1872 = vmatmul.mubr.msk.f32.gmra.mxu0 %vm326_vm0, %v367_v49 }
  0x73   : > { %1873 = vmatprep.mubr.msk.f32.mxu0 %vm326_vm0, %v368_v51 }
  0x76   : > { %1874 = vmatmul.mubr.msk.f32.gmra.mxu0 %vm326_vm0, %v368_v51  ;;  %v438_v51 = vld [vmem:[%s2468_s26 + $0xf8] sm:$0xff] }
  0x77   : > { %1875 = vmatprep.mubr.msk.f32.mxu0 %vm326_vm0, %v369_v53  ;;  %1887 = vmatprep.subr.mxu1 %v438_v51  ;;  %v427_v51 = vld [vmem:[%s2468_s26 + $0xa0] sm:$0xff] }
  0x78   : > { %1888 = vmatpush3.msra.mxu1 %v422_v52 }
  0x7a   : > { %1876 = vmatmul.mubr.msk.f32.gmra.mxu0 %vm326_vm0, %v369_v53  ;;  %v437_v53 = vld [vmem:[%s2468_s26 + $0xf0] sm:$0xff] }
  0x7b   : > { %1877 = vmatprep.mubr.msk.f32.mxu0 %vm326_vm0, %v370_v55  ;;  %1889 = vmatprep.subr.mxu1 %v437_v53  ;;  %v411_v53 = vld [vmem:[%s2468_s26 + $0x20] sm:$0xff] }
  0x7c   : > { %1890 = vmatpush3.msra.mxu1 %v421_v54  ;;  %v2519_v54 = vld [vmem:[#allocation2 + $0x18] sm:$0xff] }
  0x7e   : > { %1878 = vmatmul.mubr.msk.f32.gmra.mxu0 %vm326_vm0, %v370_v55  ;;  %v436_v55 = vld [vmem:[%s2468_s26 + $0xe8] sm:$0xff] }
  0x7f   : > { %1879 = vmatprep.mubr.msk.f32.mxu0 %vm326_vm0, %v371_v57  ;;  %1891 = vmatprep.subr.mxu1 %v436_v55  ;;  %v426_v55 = vld [vmem:[%s2468_s26 + $0x98] sm:$0xff] }
  0x80   : > { %1892 = vmatpush3.msra.mxu1 %v420_v56  ;;  %v2627_v56 = vld [vmem:[#allocation2 + $0x68] sm:$0xff] }
  0x81   : > { %2882 = vst [vmem:[#allocation12_spill] sm:$0xff] %v2627_v56 }
  0x82   : > { %1880 = vmatmul.mubr.msk.f32.gmra.mxu0 %vm326_vm0, %v371_v57  ;;  %v435_v57 = vld [vmem:[%s2468_s26 + $0xe0] sm:$0xff] }
  0x83   : > { %1881 = vmatprep.mubr.msk.f32.mxu0 %vm326_vm0, %v372_v59  ;;  %1893 = vmatprep.subr.mxu1 %v435_v57  ;;  %v410_v57 = vld [vmem:[%s2468_s26 + $0x18] sm:$0xff] }
  0x84   : > { %1894 = vmatpush3.msra.mxu1 %v419_v58 }
  0x86   : > { %1882 = vmatmul.mubr.msk.f32.gmra.mxu0 %vm326_vm0, %v372_v59  ;;  %v434_v59 = vld [vmem:[%s2468_s26 + $0xd8] sm:$0xff] }
  0x87   : > { %1883 = vmatprep.mubr.msk.f32.mxu0 %vm326_vm0, %v373_v61  ;;  %1895 = vmatprep.subr.mxu1 %v434_v59  ;;  %v425_v59 = vld [vmem:[%s2468_s26 + $0x90] sm:$0xff] }
  0x88   : > { %1896 = vmatpush3.msra.mxu1 %v418_v60 }
  0x8a   : > { %1884 = vmatmul.mubr.msk.f32.gmra.mxu0 %vm326_vm0, %v373_v61  ;;  %v433_v61 = vld [vmem:[%s2468_s26 + $0xd0] sm:$0xff] }
  0x8b   : > { %1885 = vmatprep.mubr.msk.f32.mxu0 %vm326_vm0, %v374_v63  ;;  %1897 = vmatprep.subr.mxu1 %v433_v61  ;;  %v409_v61 = vld [vmem:[%s2468_s26 + $0x10] sm:$0xff] }
  0x8c   : > { %1898 = vmatpush3.msra.mxu1 %v417_v62  ;;  %v2533_v62 = vld [vmem:[#allocation2 + $0x20] sm:$0xff] }
  0x8e   : > { %1886 = vmatmul.mubr.msk.f32.gmra.mxu0 %vm326_vm0, %v374_v63  ;;  %v432_v63 = vld [vmem:[%s2468_s26 + $0xc8] sm:$0xff] }
  0x8f   : > { %1899 = vmatprep.subr.mxu1 %v432_v63  ;;  %v424_v63 = vld [vmem:[%s2468_s26 + $0x88] sm:$0xff] }
 0x112   : > { %v2335_v1 = vpop.f32.mrf.mxu0 }
 0x114   : > { %v2337_v2 = vpop.f32.mrf.mxu0 }
 0x115   : > { %v761_v3 = vmax.f32 %v2335_v1, %v2337_v2 }
 0x116   : > { %v2341_v4 = vpop.f32.mrf.mxu0 }
 0x117   : > { %762 = vmax.xlane.f32.xlu0 %v761_v3  ;;  %v416_v3 = vld [vmem:[%s2468_s26 + $0x48] sm:$0xff] }
 0x118   : > { %v2343_v5 = vpop.f32.mrf.mxu0  ;;  %1900 = vmatpush3.msra.mxu1 %v416_v3 }
 0x119   : > { %v764_v6 = vmax.f32 %v2341_v4, %v2343_v5 }
 0x11a   : > { %v2347_v7 = vpop.f32.mrf.mxu0 }
 0x11b   : > { %765 = vmax.xlane.f32.xlu0 %v764_v6 }
 0x11c   : > { %v2349_v8 = vpop.f32.mrf.mxu0 }
 0x11d   : > { %v767_v9 = vmax.f32 %v2347_v7, %v2349_v8 }
 0x11e   : > { %v2353_v10 = vpop.f32.mrf.mxu0 }
 0x11f   : > { %768 = vmax.xlane.f32.xlu1 %v767_v9  ;;  %v431_v9 = vld [vmem:[%s2468_s26 + $0xc0] sm:$0xff] }
 0x120   : > { %v2355_v11 = vpop.f32.mrf.mxu0  ;;  %1901 = vmatprep.subr.mxu1 %v431_v9 }
 0x121   : > { %v770_v12 = vmax.f32 %v2353_v10, %v2355_v11  ;;  %1902 = vmatpush3.msra.mxu1 %v415_v14  ;;  %v423_v14 = vld [vmem:[%s2468_s26 + $0x80] sm:$0xff] }
 0x122   : > { %v2359_v13 = vpop.f32.mrf.mxu0 }
 0x123   : > { %771 = vmax.xlane.f32.xlu1 %v770_v12 }
 0x124   : > { %v2361_v15 = vpop.f32.mrf.mxu0 }
 0x125   : > { %v773_v16 = vmax.f32 %v2359_v13, %v2361_v15 }
 0x126   : > { %v2365_v17 = vpop.f32.mrf.mxu0 }
 0x127   : > { %774 = vmax.xlane.f32.xlu0 %v773_v16  ;;  %v2491_v16 = vld [vmem:[#allocation2 + $0x8] sm:$0xff] }
 0x128   : > { %v2367_v18 = vpop.f32.mrf.mxu0 }
 0x129   : > { %v776_v19 = vmax.f32 %v2365_v17, %v2367_v18 }
 0x12a   : > { %v2371_v20 = vpop.f32.mrf.mxu0 }
 0x12b   : > { %777 = vmax.xlane.f32.xlu1 %v776_v19  ;;  %v430_v19 = vld [vmem:[%s2468_s26 + $0xb8] sm:$0xff] }
 0x12c   : > { %v2373_v21 = vpop.f32.mrf.mxu0  ;;  %1903 = vmatprep.subr.mxu1 %v430_v19 }
 0x12d   : > { %v779_v22 = vmax.f32 %v2371_v20, %v2373_v21  ;;  %1904 = vmatpush3.msra.mxu1 %v414_v24  ;;  %v407_v24 = vld [vmem:[%s2468_s26] sm:$0xff] }
 0x12e   : > { %v2377_v23 = vpop.f32.mrf.mxu0 }
 0x12f   : > { %780 = vmax.xlane.f32.xlu0 %v779_v22 }
 0x130   : > { %v2411_v25 = vpop.f32.mrf.mxu0 }
 0x131   : > { %v782_v26 = vmax.f32 %v2377_v23, %v2411_v25 }
 0x132   : > { %v2415_v27 = vpop.f32.mrf.mxu0 }
 0x133   : > { %783 = vmax.xlane.f32.xlu1 %v782_v26 }
 0x134   : > { %v2417_v28 = vpop.f32.mrf.mxu0 }
 0x135   : > { %v785_v29 = vmax.f32 %v2415_v27, %v2417_v28 }
 0x136   : > { %v2421_v30 = vpop.f32.mrf.mxu0 }
 0x137   : > { %786 = vmax.xlane.f32.xlu0 %v785_v29  ;;  %v429_v29 = vld [vmem:[%s2468_s26 + $0xb0] sm:$0xff] }
 0x138   : > { %v2423_v31 = vpop.f32.mrf.mxu0  ;;  %1905 = vmatprep.subr.mxu1 %v429_v29  ;;  %v2617_v29 = vld [vmem:[#allocation2 + $0x60] sm:$0xff] }
 0x139   : > { %v788_v32 = vmax.f32 %v2421_v30, %v2423_v31  ;;  %2880 = vst [vmem:[#allocation10_spill] sm:$0xff] %v2617_v29 }
 0x13a   : > { %v2427_v33 = vpop.f32.mrf.mxu0 }
 0x13b   : > { %789 = vmax.xlane.f32.xlu1 %v788_v32 }
 0x13c   : > { %v2429_v34 = vpop.f32.mrf.mxu0 }
 0x13d   : > { %v791_v35 = vmax.f32 %v2427_v33, %v2429_v34 }
 0x13e   : > { %v2433_v36 = vpop.f32.mrf.mxu0 }
 0x13f   : > { %792 = vmax.xlane.f32.xlu0 %v791_v35  ;;  %v413_v35 = vld [vmem:[%s2468_s26 + $0x30] sm:$0xff] }
 0x140   : > { %v2435_v37 = vpop.f32.mrf.mxu0  ;;  %1906 = vmatpush3.msra.mxu1 %v413_v35 }
 0x141   : > { %v794_v38 = vmax.f32 %v2433_v36, %v2435_v37 }
 0x142   : > { %v2439_v39 = vpop.f32.mrf.mxu0 }
 0x143   : > { %795 = vmax.xlane.f32.xlu1 %v794_v38  ;;  %v2505_v38 = vld [vmem:[#allocation2 + $0x10] sm:$0xff] }
 0x144   : > { %v2441_v40 = vpop.f32.mrf.mxu0 }
 0x145   : > { %v797_v41 = vmax.f32 %v2439_v39, %v2441_v40 }
 0x146   : > { %v2445_v42 = vpop.f32.mrf.mxu0 }
 0x147   : > { %798 = vmax.xlane.f32.xlu0 %v797_v41  ;;  %v428_v41 = vld [vmem:[%s2468_s26 + $0xa8] sm:$0xff] }
 0x148   : > { %v2447_v43 = vpop.f32.mrf.mxu0  ;;  %1907 = vmatprep.subr.mxu1 %v428_v41 }
 0x149   : > { %v800_v44 = vmax.f32 %v2445_v42, %v2447_v43 }
 0x14a   : > { %v2451_v45 = vpop.f32.mrf.mxu0 }
 0x14b   : > { %801 = vmax.xlane.f32.xlu1 %v800_v44  ;;  %v2637_v44 = vld [vmem:[#allocation2 + $0x70] sm:$0xff] }
 0x14c   : > { %v2453_v46 = vpop.f32.mrf.mxu0  ;;  %2884 = vst [vmem:[#allocation14_spill] sm:$0xff] %v2637_v44 }
 0x14d   : > { %v803_v47 = vmax.f32 %v2451_v45, %v2453_v46 }
 0x14e   : > { %v2457_v48 = vpop.f32.mrf.mxu0 }
 0x14f   : > { %804 = vmax.xlane.f32.xlu0 %v803_v47  ;;  %v412_v47 = vld [vmem:[%s2468_s26 + $0x28] sm:$0xff] }
 0x150   : > { %v2459_v49 = vpop.f32.mrf.mxu0  ;;  %1908 = vmatpush3.msra.mxu1 %v412_v47  ;;  %v2557_v47 = vld [vmem:[#allocation2 + $0x30] sm:$0xff] }
 0x151   : > { %v806_v50 = vmax.f32 %v2457_v48, %v2459_v49  ;;  %1909 = vmatprep.subr.mxu1 %v427_v51 }
 0x152   : > { %1910 = vmatpush3.msra.mxu1 %v411_v53 }
 0x153   : > { %807 = vmax.xlane.f32.xlu1 %v806_v50  ;;  %1911 = vmatprep.subr.mxu1 %v426_v55  ;;  %v2567_v55 = vld [vmem:[#allocation2 + $0x38] sm:$0xff] }
 0x154   : > { %1912 = vmatpush3.msra.mxu1 %v410_v57  ;;  %v2607_v57 = vld [vmem:[#allocation2 + $0x58] sm:$0xff] }
 0x155   : > { %1913 = vmatprep.subr.mxu1 %v425_v59  ;;  %2878 = vst [vmem:[#allocation8_spill] sm:$0xff] %v2607_v57 }
 0x156   : > { %1914 = vmatpush3.msra.mxu1 %v409_v61  ;;  %v2577_v61 = vld [vmem:[#allocation2 + $0x40] sm:$0xff] }
 0x157   : > { %1915 = vmatprep.subr.mxu1 %v424_v63 }
 0x1a0   : > { %v763_v6 = vpop.xlane.xlu0 %762 }
 0x1a1   : > { %v2488_v12 = vmax.f32 %v2483_v0, %v763_v6  ;;  %v408_v6 = vld [vmem:[%s2468_s26 + $0x8] sm:$0xff] }
 0x1a2   : > { %1916 = vmatpush3.msra.mxu1 %v408_v6 }
 0x1a3   : > { %1451 = vst.msk [vmem:[#allocation2] sm:$0xff] %vm293_vm1, %v2488_v12  ;;  %875 = vperm.xlu0 %1994, %v2488_v12   ;;  %1917 = vmatprep.subr.mxu1 %v423_v14  ;;  %v2587_v14 = vld [vmem:[#allocation2 + $0x48] sm:$0xff] }
 0x1a4   : > { %v766_v26 = vpop.xlane.xlu0 %765  ;;  %1918 = vmatpush3.msra.mxu1 %v407_v24 }
 0x1a5   : > { %v2502_v32 = vmax.f32 %v2491_v16, %v766_v26  ;;  %v2547_v26 = vld [vmem:[#allocation2 + $0x28] sm:$0xff] }
 0x1a7   : > { %1452 = vst.msk [vmem:[#allocation2 + $0x8] sm:$0xff] %vm293_vm1, %v2502_v32  ;;  %880 = vperm.xlu1 %1995, %v2502_v32  }
 0x1a8   : > { %v769_v50 = vpop.xlane.xlu1 %768 }
 0x1a9   : > { %v2516_v52 = vmax.f32 %v2505_v38, %v769_v50 }
 0x1ab   : > { %1453 = vst.msk [vmem:[#allocation2 + $0x10] sm:$0xff] %vm293_vm1, %v2516_v52  ;;  %885 = vperm.xlu1 %1995, %v2516_v52  }
 0x1ac   : > { %v772_v58 = vpop.xlane.xlu1 %771 }
 0x1ad   : > { %v2530_v60 = vmax.f32 %v2519_v54, %v772_v58 }
 0x1af   : > { %1454 = vst.msk [vmem:[#allocation2 + $0x18] sm:$0xff] %vm293_vm1, %v2530_v60  ;;  %890 = vperm.xlu1 %1995, %v2530_v60  }
 0x1b0   : > { %v775_v9 = vpop.xlane.xlu0 %774 }
 0x1b1   : > { %v2544_v19 = vmax.f32 %v2533_v62, %v775_v9 }
 0x1b3   : > { %1455 = vst.msk [vmem:[#allocation2 + $0x20] sm:$0xff] %vm293_vm1, %v2544_v19  ;;  %895 = vperm.xlu1 %1995, %v2544_v19  }
 0x1b4   : > { %v778_v35 = vpop.xlane.xlu1 %777 }
 0x1b5   : > { %v2555_v41 = vmax.f32 %v2547_v26, %v778_v35 }
 0x1b7   : > { %1456 = vst.msk [vmem:[#allocation2 + $0x28] sm:$0xff] %vm293_vm1, %v2555_v41  ;;  %900 = vperm.xlu1 %1995, %v2555_v41  }
 0x1b8   : > { %v781_v51 = vpop.xlane.xlu0 %780 }
 0x1b9   : > { %v2565_v53 = vmax.f32 %v2557_v47, %v781_v51 }
 0x1bb   : > { %1457 = vst.msk [vmem:[#allocation2 + $0x30] sm:$0xff] %vm293_vm1, %v2565_v53  ;;  %905 = vperm.xlu1 %1995, %v2565_v53  }
 0x1bc   : > { %v784_v58 = vpop.xlane.xlu1 %783 }
 0x1bd   : > { %v2575_v59 = vmax.f32 %v2567_v55, %v784_v58  ;;  %v2597_v58 = vld [vmem:[#allocation2 + $0x50] sm:$0xff] }
 0x1be   : > { %2876 = vst [vmem:[#allocation6_spill] sm:$0xff] %v2597_v58 }
 0x1bf   : > { %1458 = vst.msk [vmem:[#allocation2 + $0x38] sm:$0xff] %vm293_vm1, %v2575_v59  ;;  %910 = vperm.xlu1 %1995, %v2575_v59  }
 0x1c0   : > { %v787_v6 = vpop.xlane.xlu0 %786 }
 0x1c1   : > { %v2585_v9 = vmax.f32 %v2577_v61, %v787_v6 }
 0x1c3   : > { %1459 = vst.msk [vmem:[#allocation2 + $0x40] sm:$0xff] %vm293_vm1, %v2585_v9  ;;  %915 = vperm.xlu1 %1995, %v2585_v9  }
 0x1c4   : > { %v790_v35 = vpop.xlane.xlu1 %789 }
 0x1c5   : > { %v2595_v51 = vmax.f32 %v2587_v14, %v790_v35 }
 0x1c7   : > { %2875 = vst [vmem:[#allocation5_spill] sm:$0xff] %v2595_v51  ;;  %1460 = vst.msk [vmem:[#allocation2 + $0x48] sm:$0xff] %vm293_vm1, %v2595_v51  ;;  %920 = vperm.xlu0 %1994, %v2595_v51  }
 0x1c8   : > { %v793_v24 = vpop.xlane.xlu0 %792 }
 0x1c9   : > { %v2605_v63 = vmax.f32 %v2597_v58, %v793_v24 }
 0x1cb   : > { %2877 = vst [vmem:[#allocation7_spill] sm:$0xff] %v2605_v63  ;;  %1461 = vst.msk [vmem:[#allocation2 + $0x50] sm:$0xff] %vm293_vm1, %v2605_v63  ;;  %925 = vperm.xlu1 %1995, %v2605_v63  }
 0x1cc   : > { %v796_v6 = vpop.xlane.xlu1 %795 }
 0x1cd   : > { %v2615_v50 = vmax.f32 %v2607_v57, %v796_v6 }
 0x1cf   : > { %2879 = vst [vmem:[#allocation9_spill] sm:$0xff] %v2615_v50  ;;  %1462 = vst.msk [vmem:[#allocation2 + $0x58] sm:$0xff] %vm293_vm1, %v2615_v50  ;;  %930 = vperm.xlu0 %1994, %v2615_v50   ;;  %v2647_v50 = vld [vmem:[#allocation2 + $0x78] sm:$0xff] }
 0x1d0   : > { %v799_v35 = vpop.xlane.xlu0 %798  ;;  %2886 = vst [vmem:[#allocation16_spill] sm:$0xff] %v2647_v50 }
 0x1d1   : > { %v2625_v3 = vmax.f32 %v2617_v29, %v799_v35 }
 0x1d3   : > { %2881 = vst [vmem:[#allocation11_spill] sm:$0xff] %v2625_v3  ;;  %1463 = vst.msk [vmem:[#allocation2 + $0x60] sm:$0xff] %vm293_vm1, %v2625_v3  ;;  %935 = vperm.xlu1 %1995, %v2625_v3  }
 0x1d4   : > { %v802_v24 = vpop.xlane.xlu1 %801 }
 0x1d5   : > { %v2635_v22 = vmax.f32 %v2627_v56, %v802_v24 }
 0x1d7   : > { %2883 = vst [vmem:[#allocation13_spill] sm:$0xff] %v2635_v22  ;;  %1464 = vst.msk [vmem:[#allocation2 + $0x68] sm:$0xff] %vm293_vm1, %v2635_v22  ;;  %940 = vperm.xlu0 %1994, %v2635_v22  }
 0x1d8   : > { %v805_v6 = vpop.xlane.xlu0 %804 }
 0x1d9   : > { %v2645_v29 = vmax.f32 %v2637_v44, %v805_v6 }
 0x1db   : > { %2885 = vst [vmem:[#allocation15_spill] sm:$0xff] %v2645_v29  ;;  %1465 = vst.msk [vmem:[#allocation2 + $0x70] sm:$0xff] %vm293_vm1, %v2645_v29  ;;  %945 = vperm.xlu1 %1995, %v2645_v29  }
 0x1dc   : > { %v808_v35 = vpop.xlane.xlu1 %807 }
 0x1dd   : > { %v2655_v56 = vmax.f32 %v2647_v50, %v808_v35 }
 0x1df   : > { %2887 = vst [vmem:[#allocation17_spill] sm:$0xff] %v2655_v56  ;;  %1466 = vst.msk [vmem:[#allocation2 + $0x78] sm:$0xff] %vm293_vm1, %v2655_v56  ;;  %950 = vperm.xlu0 %1994, %v2655_v56  }
 0x21e   : > { %v876_v6 = vpop.permute.xlu0 %875 }
 0x21f   : > { %v953_v24 = vsub.f32 %v2335_v1, %v876_v6  ;;  %v954_v44 = vsub.f32 %v2337_v2, %v876_v6 }
 0x221   : > { %v985_v3 = vmul.f32 1.442695, %v953_v24  ;;  %v987_v57 = vmul.f32 1.442695, %v954_v44 }
 0x222   : > { %v881_v29 = vpop.permute.xlu1 %880 }
 0x223   : > { %1996 = vpow2.f32 %v985_v3  ;;  %v955_v35 = vsub.f32 %v2341_v4, %v881_v29  ;;  %v956_v63 = vsub.f32 %v2343_v5, %v881_v29 }
 0x224   : > { %1998 = vpow2.f32 %v987_v57 }
 0x225   : > { %v989_v22 = vmul.f32 1.442695, %v955_v35  ;;  %v991_v50 = vmul.f32 1.442695, %v956_v63 }
 0x226   : > { %v886_v58 = vpop.permute.xlu1 %885 }
 0x227   : > { %2000 = vpow2.f32 %v989_v22  ;;  %v957_v56 = vsub.f32 %v2347_v7, %v886_v58  ;;  %v958_v51 = vsub.f32 %v2349_v8, %v886_v58 }
 0x228   : > { %2002 = vpow2.f32 %v991_v50 }
 0x229   : > { %v993_v1 = vmul.f32 1.442695, %v957_v56  ;;  %v995_v2 = vmul.f32 1.442695, %v958_v51 }
 0x22a   : > { %v891_v24 = vpop.permute.xlu1 %890 }
 0x22b   : > { %2004 = vpow2.f32 %v993_v1  ;;  %v959_v44 = vsub.f32 %v2353_v10, %v891_v24  ;;  %v960_v4 = vsub.f32 %v2355_v11, %v891_v24 }
 0x22c   : > { %2006 = vpow2.f32 %v995_v2 }
 0x22d   : > { %v997_v5 = vmul.f32 1.442695, %v959_v44  ;;  %v999_v3 = vmul.f32 1.442695, %v960_v4 }
 0x22e   : > { %v896_v29 = vpop.permute.xlu1 %895 }
 0x22f   : > { %2008 = vpow2.f32 %v997_v5  ;;  %v961_v22 = vsub.f32 %v2359_v13, %v896_v29  ;;  %v962_v7 = vsub.f32 %v2361_v15, %v896_v29 }
 0x230   : > { %v1997_v57 = vpop.eup %1996  ;;  %2010 = vpow2.f32 %v999_v3 }
 0x231   : > { %v1999_v8 = vpop.eup %1998  ;;  %v1001_v56 = vmul.f32 1.442695, %v961_v22  ;;  %v1003_v50 = vmul.f32 1.442695, %v962_v7 }
 0x232   : > { %1338 = vmatprep.mubr.f32.mxu1 %v1999_v8  ;;  %v901_v63 = vpop.permute.xlu1 %900  ;;  %v1081_v51 = vadd.f32 %v1999_v8, %v1997_v57 }
 0x233   : > { %2012 = vpow2.f32 %v1001_v56  ;;  %1339 = vmatmul.mubr.f32.vlgmr.msra.gmra.mxu1 %v1997_v57  ;;  %v963_v10 = vsub.f32 %v2365_v17, %v901_v63  ;;  %v964_v11 = vsub.f32 %v2367_v18, %v901_v63 }
 0x234   : > { %v2001_v58 = vpop.eup %2000  ;;  %2014 = vpow2.f32 %v1003_v50  ;;  %1082 = vadd.xlane.f32.xlu1 %v1081_v51 }
 0x235   : > { %v2003_v13 = vpop.eup %2002  ;;  %v1005_v6 = vmul.f32 1.442695, %v963_v10  ;;  %v1007_v15 = vmul.f32 1.442695, %v964_v11 }
 0x236   : > { %1343 = vmatprep.mubr.f32.mxu1 %v2003_v13  ;;  %v906_v35 = vpop.permute.xlu1 %905  ;;  %v1084_v1 = vadd.f32 %v2003_v13, %v2001_v58 }
 0x237   : > { %2016 = vpow2.f32 %v1005_v6  ;;  %1344 = vmatmul.mubr.f32.gmra.mxu1 %v2001_v58  ;;  %v965_v2 = vsub.f32 %v2371_v20, %v906_v35  ;;  %v966_v24 = vsub.f32 %v2373_v21, %v906_v35 }
 0x238   : > { %v2005_v44 = vpop.eup %2004  ;;  %2018 = vpow2.f32 %v1007_v15  ;;  %1085 = vadd.xlane.f32.xlu0 %v1084_v1 }
 0x239   : > { %v2007_v17 = vpop.eup %2006  ;;  %v1009_v18 = vmul.f32 1.442695, %v965_v2  ;;  %v1011_v4 = vmul.f32 1.442695, %v966_v24 }
 0x23a   : > { %1348 = vmatprep.mubr.f32.mxu1 %v2007_v17  ;;  %v911_v5 = vpop.permute.xlu1 %910  ;;  %v1087_v3 = vadd.f32 %v2007_v17, %v2005_v44 }
 0x23b   : > { %2020 = vpow2.f32 %v1009_v18  ;;  %1349 = vmatmul.mubr.f32.gmra.mxu1 %v2005_v44  ;;  %v967_v29 = vsub.f32 %v2377_v23, %v911_v5  ;;  %v968_v22 = vsub.f32 %v2411_v25, %v911_v5 }
 0x23c   : > { %v2009_v7 = vpop.eup %2008  ;;  %2022 = vpow2.f32 %v1011_v4  ;;  %1088 = vadd.xlane.f32.xlu0 %v1087_v3 }
 0x23d   : > { %v2011_v20 = vpop.eup %2010  ;;  %v1013_v21 = vmul.f32 1.442695, %v967_v29  ;;  %v1015_v57 = vmul.f32 1.442695, %v968_v22 }
 0x23e   : > { %1353 = vmatprep.mubr.f32.mxu1 %v2011_v20  ;;  %v916_v8 = vpop.permute.xlu1 %915  ;;  %v1090_v56 = vadd.f32 %v2011_v20, %v2009_v7 }
 0x23f   : > { %2024 = vpow2.f32 %v1013_v21  ;;  %1354 = vmatmul.mubr.f32.gmra.mxu1 %v2009_v7  ;;  %v969_v50 = vsub.f32 %v2415_v27, %v916_v8  ;;  %v970_v63 = vsub.f32 %v2417_v28, %v916_v8 }
 0x240   : > { %v2013_v51 = vpop.eup %2012  ;;  %2026 = vpow2.f32 %v1015_v57  ;;  %1091 = vadd.xlane.f32.xlu1 %v1090_v56 }
 0x241   : > { %v2015_v23 = vpop.eup %2014  ;;  %v1017_v25 = vmul.f32 1.442695, %v969_v50  ;;  %v1019_v10 = vmul.f32 1.442695, %v970_v63 }
 0x242   : > { %1358 = vmatprep.mubr.f32.mxu1 %v2015_v23  ;;  %v921_v11 = vpop.permute.xlu0 %920  ;;  %v1093_v58 = vadd.f32 %v2015_v23, %v2013_v51 }
 0x243   : > { %2028 = vpow2.f32 %v1017_v25  ;;  %v971_v13 = vsub.f32 %v2421_v30, %v921_v11  ;;  %v972_v6 = vsub.f32 %v2423_v31, %v921_v11  ;;  %1359 = vmatmul.mubr.f32.gmra.mxu1 %v2013_v51 }
 0x244   : > { %v2017_v15 = vpop.eup %2016  ;;  %2030 = vpow2.f32 %v1019_v10  ;;  %1094 = vadd.xlane.f32.xlu0 %v1093_v58 }
 0x245   : > { %v2019_v27 = vpop.eup %2018  ;;  %v1021_v28 = vmul.f32 1.442695, %v971_v13  ;;  %v1023_v35 = vmul.f32 1.442695, %v972_v6 }
 0x246   : > { %1363 = vmatprep.mubr.f32.mxu1 %v2019_v27  ;;  %v926_v1 = vpop.permute.xlu1 %925  ;;  %v1096_v2 = vadd.f32 %v2019_v27, %v2017_v15 }
 0x247   : > { %2032 = vpow2.f32 %v1021_v28  ;;  %1364 = vmatmul.mubr.f32.gmra.mxu1 %v2017_v15  ;;  %v973_v24 = vsub.f32 %v2427_v33, %v926_v1  ;;  %v974_v44 = vsub.f32 %v2429_v34, %v926_v1 }
 0x248   : > { %v2021_v17 = vpop.eup %2020  ;;  %2034 = vpow2.f32 %v1023_v35  ;;  %1097 = vadd.xlane.f32.xlu1 %v1096_v2 }
 0x249   : > { %v2023_v30 = vpop.eup %2022  ;;  %v1025_v31 = vmul.f32 1.442695, %v973_v24  ;;  %v1027_v18 = vmul.f32 1.442695, %v974_v44 }
 0x24a   : > { %1368 = vmatprep.mubr.f32.mxu1 %v2023_v30  ;;  %v931_v4 = vpop.permute.xlu0 %930  ;;  %v1099_v5 = vadd.f32 %v2023_v30, %v2021_v17 }
 0x24b   : > { %2036 = vpow2.f32 %v1025_v31  ;;  %v975_v3 = vsub.f32 %v2433_v36, %v931_v4  ;;  %v976_v29 = vsub.f32 %v2435_v37, %v931_v4  ;;  %1369 = vmatmul.mubr.f32.gmra.mxu1 %v2021_v17 }
 0x24c   : > { %v2025_v22 = vpop.eup %2024  ;;  %2038 = vpow2.f32 %v1027_v18  ;;  %1100 = vadd.xlane.f32.xlu0 %v1099_v5 }
 0x24d   : > { %v2027_v33 = vpop.eup %2026  ;;  %v1029_v34 = vmul.f32 1.442695, %v975_v3  ;;  %v1031_v7 = vmul.f32 1.442695, %v976_v29 }
 0x24e   : > { %1373 = vmatprep.mubr.f32.mxu1 %v2027_v33  ;;  %v936_v20 = vpop.permute.xlu1 %935  ;;  %v1102_v21 = vadd.f32 %v2027_v33, %v2025_v22 }
 0x24f   : > { %2040 = vpow2.f32 %v1029_v34  ;;  %1374 = vmatmul.mubr.f32.gmra.mxu1 %v2025_v22  ;;  %v977_v57 = vsub.f32 %v2439_v39, %v936_v20  ;;  %v978_v8 = vsub.f32 %v2441_v40, %v936_v20  ;;  %v2888_v20 = vsub.f32 %v2491_v16, %v2502_v32 }
 0x250   : > { %v2029_v56 = vpop.eup %2028  ;;  %2042 = vpow2.f32 %v1031_v7  ;;  %1103 = vadd.xlane.f32.xlu1 %v1102_v21  ;;  %v2892_v16 = vsub.f32 %v2533_v62, %v2544_v19  ;;  %v2896_v62 = vsub.f32 %v2577_v61, %v2585_v9 }
 0x251   : > { %v2031_v36 = vpop.eup %2030  ;;  %v1033_v37 = vmul.f32 1.442695, %v977_v57  ;;  %v1035_v50 = vmul.f32 1.442695, %v978_v8  ;;  %v843_v21 = vmul.f32 1.442695, %v2888_v20  ;;  %v2889_v57 = vsub.f32 %v2483_v0, %v2488_v12 }
 0x252   : > { %1378 = vmatprep.mubr.f32.mxu1 %v2031_v36  ;;  %v941_v63 = vpop.permute.xlu0 %940  ;;  %v1105_v51 = vadd.f32 %v2031_v36, %v2029_v56  ;;  %v849_v32 = vmul.f32 1.442695, %v2892_v16  ;;  %v2893_v0 = vsub.f32 %v2547_v26, %v2555_v41  ;;  %v857_v19 = vmul.f32 1.442695, %v2896_v62  ;;  %v2897_v26 = vld [vmem:[#allocation5_spill] sm:$0xff]  ;;  %v1050_v20 = vld [vmem:[#allocation3 + $0x8] sm:$0xff] }
 0x253   : > { %2044 = vpow2.f32 %v1033_v37  ;;  %v979_v23 = vsub.f32 %v2445_v42, %v941_v63  ;;  %v980_v25 = vsub.f32 %v2447_v43, %v941_v63  ;;  %1379 = vmatmul.mubr.f32.gmra.mxu1 %v2029_v56  ;;  %v841_v8 = vmul.f32 1.442695, %v2889_v57  ;;  %v1052_v16 = vld [vmem:[#allocation3 + $0x18] sm:$0xff] }
 0x254   : > { %v2033_v10 = vpop.eup %2032  ;;  %2046 = vpow2.f32 %v1035_v50  ;;  %1106 = vadd.xlane.f32.xlu0 %v1105_v51  ;;  %v2890_v56 = vsub.f32 %v2505_v38, %v2516_v52  ;;  %v2891_v37 = vsub.f32 %v2519_v54, %v2530_v60  ;;  %v851_v12 = vmul.f32 1.442695, %v2893_v0 }
 0x255   : > { %v2035_v39 = vpop.eup %2034  ;;  %v1037_v40 = vmul.f32 1.442695, %v979_v23  ;;  %v1039_v11 = vmul.f32 1.442695, %v980_v25  ;;  %v2894_v38 = vsub.f32 %v2557_v47, %v2565_v53  ;;  %v2895_v54 = vsub.f32 %v2567_v55, %v2575_v59  ;;  %v2899_v47 = vld [vmem:[#allocation6_spill] sm:$0xff]  ;;  %v2900_v53 = vld [vmem:[#allocation7_spill] sm:$0xff] }
 0x256   : > { %1383 = vmatprep.mubr.f32.mxu1 %v2035_v39  ;;  %v946_v58 = vpop.permute.xlu1 %945  ;;  %v1108_v13 = vadd.f32 %v2035_v39, %v2033_v10  ;;  %v845_v36 = vmul.f32 1.442695, %v2890_v56  ;;  %v847_v50 = vmul.f32 1.442695, %v2891_v37  ;;  %v2898_v41 = vsub.f32 %v2587_v14, %v2897_v26  ;;  %v2903_v39 = vld [vmem:[#allocation9_spill] sm:$0xff]  ;;  %v2905_v14 = vld [vmem:[#allocation10_spill] sm:$0xff] }
 0x257   : > { %2048 = vpow2.f32 %v1037_v40  ;;  %1384 = vmatmul.mubr.f32.gmra.mxu1 %v2033_v10  ;;  %v981_v6 = vsub.f32 %v2451_v45, %v946_v58  ;;  %v982_v15 = vsub.f32 %v2453_v46, %v946_v58  ;;  %v853_v52 = vmul.f32 1.442695, %v2894_v38  ;;  %v2902_v10 = vld [vmem:[#allocation8_spill] sm:$0xff]  ;;  %v1051_v56 = vld [vmem:[#allocation3 + $0x10] sm:$0xff] }
 0x258   : > { %v2037_v27 = vpop.eup %2036  ;;  %2050 = vpow2.f32 %v1039_v11  ;;  %1109 = vadd.xlane.f32.xlu1 %v1108_v13  ;;  %v855_v60 = vmul.f32 1.442695, %v2895_v54  ;;  %v859_v51 = vmul.f32 1.442695, %v2898_v41  ;;  %v2901_v25 = vsub.f32 %v2899_v47, %v2900_v53  ;;  %v2906_v11 = vld [vmem:[#allocation11_spill] sm:$0xff] }
 0x259   : > { %v2039_v42 = vpop.eup %2038  ;;  %v1041_v43 = vmul.f32 1.442695, %v981_v6  ;;  %v1043_v28 = vmul.f32 1.442695, %v982_v15  ;;  %v2904_v61 = vsub.f32 %v2902_v10, %v2903_v39  ;;  %v2907_v58 = vsub.f32 %v2905_v14, %v2906_v11  ;;  %v2908_v15 = vld [vmem:[#allocation12_spill] sm:$0xff]  ;;  %v1055_v47 = vld [vmem:[#allocation3 + $0x30] sm:$0xff] }
 0x25a   : > { %1388 = vmatprep.mubr.f32.mxu1 %v2039_v42  ;;  %v951_v35 = vpop.permute.xlu0 %950  ;;  %v1111_v1 = vadd.f32 %v2039_v42, %v2037_v27  ;;  %v861_v55 = vmul.f32 1.442695, %v2901_v25  ;;  %v1056_v39 = vld [vmem:[#allocation3 + $0x38] sm:$0xff] }
 0x25b   : > { %2052 = vpow2.f32 %v1041_v43  ;;  %v983_v2 = vsub.f32 %v2457_v48, %v951_v35  ;;  %v984_v24 = vsub.f32 %v2459_v49, %v951_v35  ;;  %1389 = vmatmul.mubr.f32.gmra.mxu1 %v2037_v27  ;;  %v863_v9 = vmul.f32 1.442695, %v2904_v61  ;;  %v2909_v27 = vld [vmem:[#allocation13_spill] sm:$0xff]  ;;  %v2911_v35 = vld [vmem:[#allocation14_spill] sm:$0xff] }
 0x25c   : > { %v2041_v44 = vpop.eup %2040  ;;  %2054 = vpow2.f32 %v1043_v28  ;;  %1112 = vadd.xlane.f32.xlu0 %v1111_v1  ;;  %v865_v13 = vmul.f32 1.442695, %v2907_v58  ;;  %v2910_v42 = vsub.f32 %v2908_v15, %v2909_v27  ;;  %v2912_v1 = vld [vmem:[#allocation15_spill] sm:$0xff]  ;;  %v1057_v58 = vld [vmem:[#allocation3 + $0x40] sm:$0xff] }
 0x25d   : > { %v2043_v45 = vpop.eup %2042  ;;  %v1045_v46 = vmul.f32 1.442695, %v983_v2  ;;  %v1047_v17 = vmul.f32 1.442695, %v984_v24  ;;  %v2913_v2 = vsub.f32 %v2911_v35, %v2912_v1 }
 0x25e   : > { %1393 = vmatprep.mubr.f32.mxu1 %v2043_v45  ;;  %v1114_v30 = vadd.f32 %v2043_v45, %v2041_v44  ;;  %v867_v43 = vmul.f32 1.442695, %v2910_v42  ;;  %v2914_v45 = vld [vmem:[#allocation16_spill] sm:$0xff] }
 0x25f   : > { %2056 = vpow2.f32 %v1045_v46  ;;  %1394 = vmatmul.mubr.f32.gmra.mxu1 %v2041_v44  ;;  %v869_v24 = vmul.f32 1.442695, %v2913_v2  ;;  %v2915_v46 = vld [vmem:[#allocation17_spill] sm:$0xff] }
 0x260   : > { %v2045_v31 = vpop.eup %2044  ;;  %2058 = vpow2.f32 %v1047_v17  ;;  %1115 = vadd.xlane.f32.xlu1 %v1114_v30  ;;  %v2916_v17 = vsub.f32 %v2914_v45, %v2915_v46 }
 0x261   : > { %v2047_v18 = vpop.eup %2046  ;;  %2060 = vpow2.f32 %v843_v21 }
 0x262   : > { %1398 = vmatprep.mubr.f32.mxu1 %v2047_v18  ;;  %v1117_v4 = vadd.f32 %v2047_v18, %v2045_v31  ;;  %2062 = vpow2.f32 %v841_v8  ;;  %v871_v30 = vmul.f32 1.442695, %v2916_v17 }
 0x263   : > { %1399 = vmatmul.mubr.f32.gmra.mxu1 %v2045_v31  ;;  %2064 = vpow2.f32 %v845_v36 }
 0x264   : > { %v2049_v48 = vpop.eup %2048  ;;  %1118 = vadd.xlane.f32.xlu0 %v1117_v4  ;;  %2066 = vpow2.f32 %v847_v50 }
 0x265   : > { %v2051_v49 = vpop.eup %2050  ;;  %2068 = vpow2.f32 %v849_v32 }
 0x266   : > { %1403 = vmatprep.mubr.f32.mxu1 %v2051_v49  ;;  %v1120_v5 = vadd.f32 %v2051_v49, %v2049_v48  ;;  %2070 = vpow2.f32 %v851_v12 }
 0x267   : > { %1404 = vmatmul.mubr.f32.gmra.mxu1 %v2049_v48  ;;  %2072 = vpow2.f32 %v853_v52  ;;  %v1053_v52 = vld [vmem:[#allocation3 + $0x20] sm:$0xff] }
 0x268   : > { %v2053_v3 = vpop.eup %2052  ;;  %1121 = vadd.xlane.f32.xlu1 %v1120_v5  ;;  %2074 = vpow2.f32 %v855_v60 }
 0x269   : > { %v2055_v29 = vpop.eup %2054  ;;  %2076 = vpow2.f32 %v857_v19 }
 0x26a   : > { %1408 = vmatprep.mubr.f32.mxu1 %v2055_v29  ;;  %v1123_v22 = vadd.f32 %v2055_v29, %v2053_v3  ;;  %2078 = vpow2.f32 %v859_v51 }
 0x26b   : > { %1409 = vmatmul.mubr.f32.gmra.mxu1 %v2053_v3  ;;  %2080 = vpow2.f32 %v861_v55 }
 0x26c   : > { %v2057_v33 = vpop.eup %2056  ;;  %1124 = vadd.xlane.f32.xlu0 %v1123_v22  ;;  %2082 = vpow2.f32 %v863_v9 }
 0x26d   : > { %v2059_v34 = vpop.eup %2058  ;;  %2084 = vpow2.f32 %v865_v13 }
 0x26e   : > { %1413 = vmatprep.mubr.f32.mxu1 %v2059_v34  ;;  %v1126_v7 = vadd.f32 %v2059_v34, %v2057_v33  ;;  %v2061_v63 = vpop.eup %2060  ;;  %2086 = vpow2.f32 %v867_v43  ;;  %v1058_v43 = vld [vmem:[#allocation3 + $0x48] sm:$0xff] }
 0x26f   : > { %1414 = vmatmul.mubr.f32.gmra.mxu1 %v2057_v33  ;;  %v2063_v23 = vpop.eup %2062  ;;  %2088 = vpow2.f32 %v869_v24  ;;  %v1049_v33 = vld [vmem:[#allocation3] sm:$0xff]  ;;  %v1066_v57 = vmul.f32 %v2061_v63, %v1050_v20 }
 0x270   : > { %1127 = vadd.xlane.f32.xlu1 %v1126_v7  ;;  %v2065_v59 = vpop.eup %2064  ;;  %2090 = vpow2.f32 %v871_v30  ;;  %v1065_v34 = vmul.f32 %v2063_v23, %v1049_v33 }
 0x271   : > { %v2067_v40 = vpop.eup %2066  ;;  %v1067_v37 = vmul.f32 %v2065_v59, %v1051_v56 }
 0x272   : > { %v2069_v6 = vpop.eup %2068  ;;  %v1068_v12 = vmul.f32 %v2067_v40, %v1052_v16 }
 0x273   : > { %v2071_v28 = vpop.eup %2070  ;;  %v1069_v62 = vmul.f32 %v2069_v6, %v1053_v52 }
 0x274   : > { %v2073_v44 = vpop.eup %2072 }
 0x275   : > { %v2742_v31 = vpop.eup %2074  ;;  %v1071_v55 = vmul.f32 %v2073_v44, %v1055_v47 }
 0x276   : > { %v2745_v18 = vpop.eup %2076 }
 0x277   : > { %v2747_v4 = vpop.eup %2078  ;;  %v1073_v15 = vmul.f32 %v2745_v18, %v1057_v58 }
 0x278   : > { %v2751_v48 = vpop.eup %2080  ;;  %v1074_v1 = vmul.f32 %v2747_v4, %v1058_v43 }
 0x279   : > { %v2753_v49 = vpop.eup %2082 }
 0x27a   : > { %v2757_v5 = vpop.eup %2084 }
 0x27b   : > { %v2759_v3 = vpop.eup %2086 }
 0x27c   : > { %v2763_v29 = vpop.eup %2088 }
 0x27d   : > { %v2765_v22 = vpop.eup %2090 }
 0x281   : > { %1185 = vperm.xlu1 %1995, %v2061_v63   ;;  %v1054_v63 = vld [vmem:[#allocation3 + $0x28] sm:$0xff] }
 0x282   : > { %1180 = vperm.xlu0 %1994, %v2063_v23   ;;  %v1070_v51 = vmul.f32 %v2071_v28, %v1054_v63  ;;  %v1064_v63 = vld [vmem:[#allocation3 + $0x78] sm:$0xff] }
 0x285   : > { %1190 = vperm.xlu1 %1995, %v2065_v59  }
 0x286   : > { %1195 = vperm.xlu0 %1994, %v2067_v40   ;;  %v1072_v40 = vmul.f32 %v2742_v31, %v1056_v39 }
 0x289   : > { %1200 = vperm.xlu1 %1995, %v2069_v6  }
 0x28a   : > { %1205 = vperm.xlu0 %1994, %v2071_v28  }
 0x28d   : > { %1210 = vperm.xlu1 %1995, %v2073_v44   ;;  %v1059_v44 = vld [vmem:[#allocation3 + $0x50] sm:$0xff] }
 0x28e   : > { %1215 = vperm.xlu0 %1994, %v2742_v31   ;;  %v1075_v17 = vmul.f32 %v2751_v48, %v1059_v44 }
 0x291   : > { %1220 = vperm.xlu1 %1995, %v2745_v18   ;;  %v1060_v18 = vld [vmem:[#allocation3 + $0x58] sm:$0xff] }
 0x292   : > { %1225 = vperm.xlu0 %1994, %v2747_v4   ;;  %v1076_v4 = vmul.f32 %v2753_v49, %v1060_v18  ;;  %v1166_v18 = vld [vmem:[#allocation4 + $0x20] sm:$0xff] }
 0x295   : > { %1230 = vperm.xlu1 %1995, %v2751_v48  }
 0x296   : > { %1235 = vperm.xlu0 %1994, %v2753_v49  }
 0x299   : > { %1240 = vperm.xlu1 %1995, %v2757_v5  }
 0x29a   : > { %1245 = vperm.xlu0 %1994, %v2759_v3  }
 0x29d   : > { %1250 = vperm.xlu1 %1995, %v2763_v29  }
 0x29e   : > { %1255 = vperm.xlu0 %1994, %v2765_v22  }
 0x2bd   : > { %v1083_v7 = vpop.xlane.xlu1 %1082 }
 0x2be   : > { %v1129_v21 = vadd.f32 %v1083_v7, %v1065_v34 }
 0x2c0   : > { %1146 = vst.msk [vmem:[#allocation3] sm:$0xff] %vm293_vm1, %v1129_v21  ;;  %v1061_v21 = vld [vmem:[#allocation3 + $0x60] sm:$0xff] }
 0x2c1   : > { %v1086_v8 = vpop.xlane.xlu0 %1085  ;;  %v1077_v48 = vmul.f32 %v2757_v5, %v1061_v21  ;;  %v1167_v21 = vld [vmem:[#allocation4 + $0x28] sm:$0xff] }
 0x2c2   : > { %v1130_v36 = vadd.f32 %v1086_v8, %v1066_v57 }
 0x2c4   : > { %1147 = vst.msk [vmem:[#allocation3 + $0x8] sm:$0xff] %vm293_vm1, %v1130_v36 }
 0x2c5   : > { %v1089_v50 = vpop.xlane.xlu0 %1088 }
 0x2c6   : > { %v1131_v32 = vadd.f32 %v1089_v50, %v1067_v37  ;;  %v1062_v37 = vld [vmem:[#allocation3 + $0x68] sm:$0xff] }
 0x2c7   : > { %v1486_v0 = vld [vmem:[#allocation3] sm:$0xff]  ;;  %v1078_v49 = vmul.f32 %v2759_v3, %v1062_v37 }
 0x2c8   : > { %1148 = vst.msk [vmem:[#allocation3 + $0x10] sm:$0xff] %vm293_vm1, %v1131_v32  ;;  %2092 = vrcp.f32 %v1486_v0 }
 0x2c9   : > { %v1092_v38 = vpop.xlane.xlu1 %1091 }
 0x2ca   : > { %v1132_v54 = vadd.f32 %v1092_v38, %v1068_v12  ;;  %v1063_v12 = vld [vmem:[#allocation3 + $0x70] sm:$0xff] }
 0x2cb   : > { %v1487_v60 = vld [vmem:[#allocation3 + $0x8] sm:$0xff]  ;;  %v1079_v5 = vmul.f32 %v2763_v29, %v1063_v12 }
 0x2cc   : > { %1149 = vst.msk [vmem:[#allocation3 + $0x18] sm:$0xff] %vm293_vm1, %v1132_v54  ;;  %2094 = vrcp.f32 %v1487_v60 }
 0x2cd   : > { %v1095_v19 = vpop.xlane.xlu0 %1094 }
 0x2ce   : > { %v1133_v26 = vadd.f32 %v1095_v19, %v1069_v62 }
 0x2cf   : > { %v1488_v41 = vld [vmem:[#allocation3 + $0x10] sm:$0xff] }
 0x2d0   : > { %1150 = vst.msk [vmem:[#allocation3 + $0x20] sm:$0xff] %vm293_vm1, %v1133_v26  ;;  %2096 = vrcp.f32 %v1488_v41 }
 0x2d1   : > { %v1098_v23 = vpop.xlane.xlu1 %1097 }
 0x2d2   : > { %v1134_v53 = vadd.f32 %v1098_v23, %v1070_v51  ;;  %v1080_v51 = vmul.f32 %v2765_v22, %v1064_v63 }
 0x2d3   : > { %v1489_v25 = vld [vmem:[#allocation3 + $0x18] sm:$0xff] }
 0x2d4   : > { %1151 = vst.msk [vmem:[#allocation3 + $0x28] sm:$0xff] %vm293_vm1, %v1134_v53  ;;  %2098 = vrcp.f32 %v1489_v25 }
 0x2d5   : > { %v2093_v59 = vpop.eup %2092  ;;  %v1101_v10 = vpop.xlane.xlu0 %1100 }
 0x2d6   : > { %v1135_v61 = vadd.f32 %v1101_v10, %v1071_v55  ;;  %1520 = vperm.xlu1 %1995, %v2093_v59   ;;  %v1162_v55 = vld [vmem:[#allocation4] sm:$0xff]  ;;  %v1163_v10 = vld [vmem:[#allocation4 + $0x8] sm:$0xff] }
 0x2d7   : > { %v1490_v9 = vld [vmem:[#allocation3 + $0x20] sm:$0xff] }
 0x2d8   : > { %1152 = vst.msk [vmem:[#allocation3 + $0x30] sm:$0xff] %vm293_vm1, %v1135_v61  ;;  %2100 = vrcp.f32 %v1490_v9 }
 0x2d9   : > { %v2095_v14 = vpop.eup %2094  ;;  %v1104_v11 = vpop.xlane.xlu1 %1103 }
 0x2da   : > { %v1136_v13 = vadd.f32 %v1104_v11, %v1072_v40  ;;  %1525 = vperm.xlu0 %1994, %v2095_v14  }
 0x2db   : > { %v1491_v6 = vld [vmem:[#allocation3 + $0x28] sm:$0xff] }
 0x2dc   : > { %1153 = vst.msk [vmem:[#allocation3 + $0x38] sm:$0xff] %vm293_vm1, %v1136_v13  ;;  %2102 = vrcp.f32 %v1491_v6  ;;  %v1165_v6 = vld [vmem:[#allocation4 + $0x18] sm:$0xff] }
 0x2dd   : > { %v2097_v27 = vpop.eup %2096  ;;  %v1107_v42 = vpop.xlane.xlu0 %1106 }
 0x2de   : > { %v1137_v28 = vadd.f32 %v1107_v42, %v1073_v15  ;;  %1530 = vperm.xlu1 %1995, %v2097_v27   ;;  %v1164_v42 = vld [vmem:[#allocation4 + $0x10] sm:$0xff] }
 0x2df   : > { %v1492_v35 = vld [vmem:[#allocation3 + $0x30] sm:$0xff] }
 0x2e0   : > { %1154 = vst.msk [vmem:[#allocation3 + $0x40] sm:$0xff] %vm293_vm1, %v1137_v28  ;;  %2104 = vrcp.f32 %v1492_v35 }
 0x2e1   : > { %v2099_v2 = vpop.eup %2098  ;;  %v1110_v24 = vpop.xlane.xlu1 %1109 }
 0x2e2   : > { %v1138_v45 = vadd.f32 %v1110_v24, %v1074_v1  ;;  %1535 = vperm.xlu0 %1994, %v2099_v2  }
 0x2e3   : > { %v1493_v46 = vld [vmem:[#allocation3 + $0x38] sm:$0xff] }
 0x2e4   : > { %1155 = vst.msk [vmem:[#allocation3 + $0x48] sm:$0xff] %vm293_vm1, %v1138_v45  ;;  %2106 = vrcp.f32 %v1493_v46 }
 0x2e5   : > { %v2101_v30 = vpop.eup %2100  ;;  %v1113_v31 = vpop.xlane.xlu0 %1112 }
 0x2e6   : > { %v1139_v33 = vadd.f32 %v1113_v31, %v1075_v17  ;;  %1540 = vperm.xlu1 %1995, %v2101_v30  }
 0x2e7   : > { %v1494_v34 = vld [vmem:[#allocation3 + $0x40] sm:$0xff] }
 0x2e8   : > { %1156 = vst.msk [vmem:[#allocation3 + $0x50] sm:$0xff] %vm293_vm1, %v1139_v33  ;;  %2108 = vrcp.f32 %v1494_v34 }
 0x2e9   : > { %v2103_v7 = vpop.eup %2102  ;;  %v1116_v20 = vpop.xlane.xlu1 %1115 }
 0x2ea   : > { %v1140_v57 = vadd.f32 %v1116_v20, %v1076_v4  ;;  %1545 = vperm.xlu0 %1994, %v2103_v7  }
 0x2eb   : > { %v1495_v8 = vld [vmem:[#allocation3 + $0x48] sm:$0xff] }
 0x2ec   : > { %1157 = vst.msk [vmem:[#allocation3 + $0x58] sm:$0xff] %vm293_vm1, %v1140_v57  ;;  %2110 = vrcp.f32 %v1495_v8 }
 0x2ed   : > { %v2105_v56 = vpop.eup %2104  ;;  %v1119_v36 = vpop.xlane.xlu0 %1118 }
 0x2ee   : > { %v1141_v50 = vadd.f32 %v1119_v36, %v1077_v48  ;;  %1550 = vperm.xlu1 %1995, %v2105_v56  }
 0x2ef   : > { %v1496_v16 = vld [vmem:[#allocation3 + $0x50] sm:$0xff] }
 0x2f0   : > { %1158 = vst.msk [vmem:[#allocation3 + $0x60] sm:$0xff] %vm293_vm1, %v1141_v50  ;;  %2112 = vrcp.f32 %v1496_v16 }
 0x2f1   : > { %v2107_v32 = vpop.eup %2106  ;;  %v1122_v0 = vpop.xlane.xlu1 %1121 }
 0x2f2   : > { %v1142_v38 = vadd.f32 %v1122_v0, %v1078_v49  ;;  %1555 = vperm.xlu0 %1994, %v2107_v32   ;;  %v1168_v49 = vld [vmem:[#allocation4 + $0x30] sm:$0xff] }
 0x2f3   : > { %v1919_v52 = vpop.f32.mrf.mxu1  ;;  %v1497_v54 = vld [vmem:[#allocation3 + $0x58] sm:$0xff] }
 0x2f4   : > { %1159 = vst.msk [vmem:[#allocation3 + $0x68] sm:$0xff] %vm293_vm1, %v1142_v38  ;;  %2114 = vrcp.f32 %v1497_v54 }
 0x2f5   : > { %v2109_v60 = vpop.eup %2108  ;;  %v1920_v62 = vpop.f32.mrf.mxu1 }
 0x2f6   : > { %v1125_v19 = vpop.xlane.xlu0 %1124  ;;  %1560 = vperm.xlu1 %1995, %v2109_v60   ;;  %v1921_v40 = vadd.f32 %v1920_v62, %v1919_v52  ;;  %v1169_v60 = vld [vmem:[#allocation4 + $0x38] sm:$0xff] }
 0x2f7   : > { %v1143_v26 = vadd.f32 %v1125_v19, %v1079_v5  ;;  %v1922_v3 = vpop.f32.mrf.mxu1  ;;  %v1498_v41 = vld [vmem:[#allocation3 + $0x60] sm:$0xff] }
 0x2f8   : > { %2116 = vrcp.f32 %v1498_v41 }
 0x2f9   : > { %1160 = vst.msk [vmem:[#allocation3 + $0x70] sm:$0xff] %vm293_vm1, %v1143_v26  ;;  %v2111_v23 = vpop.eup %2110  ;;  %v1923_v47 = vpop.f32.mrf.mxu1 }
 0x2fa   : > { %v1128_v53 = vpop.xlane.xlu1 %1127  ;;  %1565 = vperm.xlu0 %1994, %v2111_v23   ;;  %v1924_v22 = vadd.f32 %v1923_v47, %v1922_v3  ;;  %v1170_v23 = vld [vmem:[#allocation4 + $0x40] sm:$0xff] }
 0x2fb   : > { %v1144_v25 = vadd.f32 %v1128_v53, %v1080_v51  ;;  %v1925_v29 = vpop.f32.mrf.mxu1  ;;  %v1499_v59 = vld [vmem:[#allocation3 + $0x68] sm:$0xff] }
 0x2fc   : > { %2118 = vrcp.f32 %v1499_v59 }
 0x2fd   : > { %1161 = vst.msk [vmem:[#allocation3 + $0x78] sm:$0xff] %vm293_vm1, %v1144_v25  ;;  %v2113_v39 = vpop.eup %2112  ;;  %v1926_v61 = vpop.f32.mrf.mxu1 }
 0x2fe   : > { %v1181_v9 = vpop.permute.xlu0 %1180  ;;  %v1186_v11 = vpop.permute.xlu1 %1185  ;;  %1570 = vperm.xlu1 %1995, %v2113_v39   ;;  %v1927_v45 = vadd.f32 %v1926_v61, %v1925_v29 }
 0x2ff   : > { %v1258_v14 = vmul.f32 %v1181_v9, %v1162_v55  ;;  %v1259_v58 = vmul.f32 %v1186_v11, %v1163_v10  ;;  %v1928_v13 = vpop.f32.mrf.mxu1  ;;  %v1171_v10 = vld [vmem:[#allocation4 + $0x48] sm:$0xff] }
 0x300   : > { %v1500_v15 = vld [vmem:[#allocation3 + $0x70] sm:$0xff] }
 0x301   : > { %v1419_v27 = vadd.f32 %v1921_v40, %v1258_v14  ;;  %2120 = vrcp.f32 %v1500_v15  ;;  %v2115_v43 = vpop.eup %2114  ;;  %v1420_v28 = vadd.f32 %v1924_v22, %v1259_v58  ;;  %v1929_v35 = vpop.f32.mrf.mxu1  ;;  %v1172_v22 = vld [vmem:[#allocation4 + $0x50] sm:$0xff] }
 0x302   : > { %v1196_v1 = vpop.permute.xlu0 %1195  ;;  %v1930_v2 = vadd.f32 %v1929_v35, %v1928_v13  ;;  %v1191_v44 = vpop.permute.xlu1 %1190  ;;  %1575 = vperm.xlu0 %1994, %v2115_v43   ;;  %v1173_v43 = vld [vmem:[#allocation4 + $0x58] sm:$0xff] }
 0x303   : > { %1435 = vst.msk [vmem:[#allocation4] sm:$0xff] %vm326_vm0, %v1419_v27  ;;  %v1261_v24 = vmul.f32 %v1196_v1, %v1165_v6  ;;  %1436 = vst.msk [vmem:[#allocation4 + $0x8] sm:$0xff] %vm326_vm0, %v1420_v28  ;;  %v1260_v46 = vmul.f32 %v1191_v44, %v1164_v42  ;;  %v1931_v17 = vpop.f32.mrf.mxu1 }
 0x304   : > { %v1501_v30 = vld [vmem:[#allocation3 + $0x78] sm:$0xff] }
 0x305   : > { %v1422_v31 = vadd.f32 %v1930_v2, %v1261_v24  ;;  %2122 = vrcp.f32 %v1501_v30  ;;  %v2117_v33 = vpop.eup %2116  ;;  %v1421_v34 = vadd.f32 %v1927_v45, %v1260_v46  ;;  %v1932_v4 = vpop.f32.mrf.mxu1  ;;  %v1174_v45 = vld [vmem:[#allocation4 + $0x60] sm:$0xff] }
 0x306   : > { %v1933_v7 = vadd.f32 %v1932_v4, %v1931_v17  ;;  %v1201_v20 = vpop.permute.xlu1 %1200  ;;  %1580 = vperm.xlu1 %1995, %v2117_v33   ;;  %v1206_v57 = vpop.permute.xlu0 %1205 }
 0x307   : > { %1438 = vst.msk [vmem:[#allocation4 + $0x18] sm:$0xff] %vm326_vm0, %v1422_v31  ;;  %1437 = vst.msk [vmem:[#allocation4 + $0x10] sm:$0xff] %vm326_vm0, %v1421_v34  ;;  %v1262_v8 = vmul.f32 %v1201_v20, %v1166_v18  ;;  %v1934_v48 = vpop.f32.mrf.mxu1  ;;  %v1263_v50 = vmul.f32 %v1206_v57, %v1167_v21  ;;  %v1175_v34 = vld [vmem:[#allocation4 + $0x68] sm:$0xff] }
 0x309   : > { %v2119_v56 = vpop.eup %2118  ;;  %v1423_v36 = vadd.f32 %v1933_v7, %v1262_v8  ;;  %v1935_v37 = vpop.f32.mrf.mxu1 }
 0x30a   : > { %v1936_v16 = vadd.f32 %v1935_v37, %v1934_v48  ;;  %1585 = vperm.xlu0 %1994, %v2119_v56   ;;  %v1211_v32 = vpop.permute.xlu1 %1210  ;;  %v1216_v62 = vpop.permute.xlu0 %1215  ;;  %v1176_v48 = vld [vmem:[#allocation4 + $0x70] sm:$0xff] }
 0x30b   : > { %1439 = vst.msk [vmem:[#allocation4 + $0x20] sm:$0xff] %vm326_vm0, %v1423_v36  ;;  %v1937_v0 = vpop.f32.mrf.mxu1  ;;  %v1264_v54 = vmul.f32 %v1211_v32, %v1168_v49  ;;  %v1265_v41 = vmul.f32 %v1216_v62, %v1169_v60  ;;  %v1177_v32 = vld [vmem:[#allocation4 + $0x78] sm:$0xff]  ;;  %v1470_v62 = vld [vmem:[#allocation4] sm:$0xff] }
 0x30c   : > { %v1424_v12 = vadd.f32 %v1936_v16, %v1263_v50 }
 0x30d   : > { %v1938_v52 = vpop.f32.mrf.mxu1 }
 0x30e   : > { %v2121_v38 = vpop.eup %2120  ;;  %1440 = vst.msk [vmem:[#allocation4 + $0x28] sm:$0xff] %vm326_vm0, %v1424_v12  ;;  %v1939_v5 = vadd.f32 %v1938_v52, %v1937_v0  ;;  %v1221_v47 = vpop.permute.xlu1 %1220 }
 0x30f   : > { %1590 = vperm.xlu1 %1995, %v2121_v38   ;;  %v1940_v19 = vpop.f32.mrf.mxu1  ;;  %v1266_v55 = vmul.f32 %v1221_v47, %v1170_v23  ;;  %v1226_v39 = vpop.permute.xlu0 %1225 }
 0x310   : > { %v1425_v63 = vadd.f32 %v1939_v5, %v1264_v54  ;;  %v1267_v14 = vmul.f32 %v1226_v39, %v1171_v10 }
 0x311   : > { %v1941_v3 = vpop.f32.mrf.mxu1 }
 0x312   : > { %v2123_v26 = vpop.eup %2122  ;;  %1441 = vst.msk [vmem:[#allocation4 + $0x30] sm:$0xff] %vm326_vm0, %v1425_v63  ;;  %v1942_v51 = vadd.f32 %v1941_v3, %v1940_v19  ;;  %v1231_v58 = vpop.permute.xlu1 %1230  ;;  %v1471_v3 = vld [vmem:[#allocation4 + $0x8] sm:$0xff] }
 0x313   : > { %1595 = vperm.xlu0 %1994, %v2123_v26   ;;  %v1943_v53 = vpop.f32.mrf.mxu1  ;;  %v1268_v27 = vmul.f32 %v1231_v58, %v1172_v22  ;;  %v1236_v28 = vpop.permute.xlu0 %1235 }
 0x314   : > { %v1426_v25 = vadd.f32 %v1942_v51, %v1265_v41  ;;  %v1269_v24 = vmul.f32 %v1236_v28, %v1173_v43  ;;  %v1472_v51 = vld [vmem:[#allocation4 + $0x10] sm:$0xff] }
 0x315   : > { %v1944_v29 = vpop.f32.mrf.mxu1  ;;  %v1475_v39 = vld [vmem:[#allocation4 + $0x28] sm:$0xff] }
 0x316   : > { %1442 = vst.msk [vmem:[#allocation4 + $0x38] sm:$0xff] %vm326_vm0, %v1426_v25  ;;  %v1945_v59 = vadd.f32 %v1944_v29, %v1943_v53  ;;  %v1241_v46 = vpop.permute.xlu1 %1240  ;;  %v1473_v53 = vld [vmem:[#allocation4 + $0x18] sm:$0xff] }
 0x317   : > { %v1946_v61 = vpop.f32.mrf.mxu1  ;;  %v1270_v18 = vmul.f32 %v1241_v46, %v1174_v45  ;;  %v1246_v4 = vpop.permute.xlu0 %1245 }
 0x318   : > { %v1427_v9 = vadd.f32 %v1945_v59, %v1266_v55  ;;  %v1271_v57 = vmul.f32 %v1246_v4, %v1175_v34  ;;  %v1474_v55 = vld [vmem:[#allocation4 + $0x20] sm:$0xff] }
 0x319   : > { %v1947_v40 = vpop.f32.mrf.mxu1 }
 0x31a   : > { %1443 = vst.msk [vmem:[#allocation4 + $0x40] sm:$0xff] %vm326_vm0, %v1427_v9  ;;  %v1948_v11 = vadd.f32 %v1947_v40, %v1946_v61  ;;  %v1251_v56 = vpop.permute.xlu1 %1250  ;;  %v1476_v40 = vld [vmem:[#allocation4 + $0x30] sm:$0xff] }
 0x31b   : > { %v1949_v13 = vpop.f32.mrf.mxu1  ;;  %v1272_v16 = vmul.f32 %v1251_v56, %v1176_v48  ;;  %v1256_v0 = vpop.permute.xlu0 %1255 }
 0x31c   : > { %v1428_v6 = vadd.f32 %v1948_v11, %v1267_v14  ;;  %v1273_v54 = vmul.f32 %v1256_v0, %v1177_v32 }
 0x31d   : > { %v1950_v15 = vpop.f32.mrf.mxu1  ;;  %v1477_v22 = vld [vmem:[#allocation4 + $0x38] sm:$0xff] }
 0x31e   : > { %1444 = vst.msk [vmem:[#allocation4 + $0x48] sm:$0xff] %vm326_vm0, %v1428_v6  ;;  %v1951_v42 = vadd.f32 %v1950_v15, %v1949_v13 }
 0x31f   : > { %v1952_v35 = vpop.f32.mrf.mxu1 }
 0x320   : > { %v1429_v1 = vadd.f32 %v1951_v42, %v1268_v27 }
 0x321   : > { %v1953_v2 = vpop.f32.mrf.mxu1  ;;  %v1478_v6 = vld [vmem:[#allocation4 + $0x40] sm:$0xff] }
 0x322   : > { %1445 = vst.msk [vmem:[#allocation4 + $0x50] sm:$0xff] %vm326_vm0, %v1429_v1  ;;  %v1954_v44 = vadd.f32 %v1953_v2, %v1952_v35 }
 0x323   : > { %v1955_v17 = vpop.f32.mrf.mxu1 }
 0x324   : > { %v1430_v30 = vadd.f32 %v1954_v44, %v1269_v24 }
 0x325   : > { %v1956_v31 = vpop.f32.mrf.mxu1  ;;  %v1479_v42 = vld [vmem:[#allocation4 + $0x48] sm:$0xff] }
 0x326   : > { %1446 = vst.msk [vmem:[#allocation4 + $0x58] sm:$0xff] %vm326_vm0, %v1430_v30  ;;  %v1957_v33 = vadd.f32 %v1956_v31, %v1955_v17 }
 0x327   : > { %v1958_v7 = vpop.f32.mrf.mxu1 }
 0x328   : > { %v1431_v20 = vadd.f32 %v1957_v33, %v1270_v18 }
 0x329   : > { %v1959_v21 = vpop.f32.mrf.mxu1  ;;  %v1480_v35 = vld [vmem:[#allocation4 + $0x50] sm:$0xff] }
 0x32a   : > { %1447 = vst.msk [vmem:[#allocation4 + $0x60] sm:$0xff] %vm326_vm0, %v1431_v20  ;;  %v1960_v8 = vadd.f32 %v1959_v21, %v1958_v7 }
 0x32b   : > { %v1961_v36 = vpop.f32.mrf.mxu1 }
 0x32c   : > { %v1432_v37 = vadd.f32 %v1960_v8, %v1271_v57 }
 0x32d   : > { %v1962_v50 = vpop.f32.mrf.mxu1  ;;  %v1481_v24 = vld [vmem:[#allocation4 + $0x58] sm:$0xff] }
 0x32e   : > { %1448 = vst.msk [vmem:[#allocation4 + $0x68] sm:$0xff] %vm326_vm0, %v1432_v37  ;;  %v1963_v49 = vadd.f32 %v1962_v50, %v1961_v36 }
 0x32f   : > { %v1964_v12 = vpop.f32.mrf.mxu1 }
 0x330   : > { %v1433_v38 = vadd.f32 %v1963_v49, %v1272_v16 }
 0x331   : > { %v1965_v52 = vpop.f32.mrf.mxu1  ;;  %v1482_v46 = vld [vmem:[#allocation4 + $0x60] sm:$0xff] }
 0x332   : > { %1449 = vst.msk [vmem:[#allocation4 + $0x70] sm:$0xff] %vm326_vm0, %v1433_v38  ;;  %v1966_v5 = vadd.f32 %v1965_v52, %v1964_v12 }
 0x334   : > { %v1434_v60 = vadd.f32 %v1966_v5, %v1273_v54 }
 0x335   : > { %v1483_v31 = vld [vmem:[#allocation4 + $0x68] sm:$0xff] }
 0x336   : > { %1450 = vst.msk [vmem:[#allocation4 + $0x78] sm:$0xff] %vm326_vm0, %v1434_v60 }
 0x339   : > { %v1484_v34 = vld [vmem:[#allocation4 + $0x70] sm:$0xff] }
 0x33d   : > { %v1485_v20 = vld [vmem:[#allocation4 + $0x78] sm:$0xff] }
 0x351   : > { %v1521_v19 = vpop.permute.xlu1 %1520 }
 0x352   : > { %v1598_v63 = vmul.f32 %v1521_v19, %v1470_v62 }
 0x354   : > { %1614 = vst.msk [vmem:[%s2815_s29] sm:$0xff] %vm326_vm0, %v1598_v63 }
 0x355   : > { %v1526_v26 = vpop.permute.xlu0 %1525 }
 0x356   : > { %v1599_v41 = vmul.f32 %v1526_v26, %v1471_v3 }
 0x358   : > { %1615 = vst.msk [vmem:[%s2815_s29 + $0x8] sm:$0xff] %vm326_vm0, %v1599_v41 }
 0x359   : > { %v1531_v23 = vpop.permute.xlu1 %1530 }
 0x35a   : > { %v1600_v47 = vmul.f32 %v1531_v23, %v1472_v51 }
 0x35c   : > { %1616 = vst.msk [vmem:[%s2815_s29 + $0x10] sm:$0xff] %vm326_vm0, %v1600_v47 }
 0x35d   : > { %v1536_v25 = vpop.permute.xlu0 %1535 }
 0x35e   : > { %v1601_v29 = vmul.f32 %v1536_v25, %v1473_v53 }
 0x360   : > { %1617 = vst.msk [vmem:[%s2815_s29 + $0x18] sm:$0xff] %vm326_vm0, %v1601_v29 }
 0x361   : > { %v1541_v59 = vpop.permute.xlu1 %1540 }
 0x362   : > { %v1602_v10 = vmul.f32 %v1541_v59, %v1474_v55 }
 0x364   : > { %1618 = vst.msk [vmem:[%s2815_s29 + $0x20] sm:$0xff] %vm326_vm0, %v1602_v10 }
 0x365   : > { %v1546_v61 = vpop.permute.xlu0 %1545 }
 0x366   : > { %v1603_v9 = vmul.f32 %v1546_v61, %v1475_v39 }
 0x368   : > { %1619 = vst.msk [vmem:[%s2815_s29 + $0x28] sm:$0xff] %vm326_vm0, %v1603_v9 }
 0x369   : > { %v1551_v14 = vpop.permute.xlu1 %1550 }
 0x36a   : > { %v1604_v11 = vmul.f32 %v1551_v14, %v1476_v40 }
 0x36c   : > { %1620 = vst.msk [vmem:[%s2815_s29 + $0x30] sm:$0xff] %vm326_vm0, %v1604_v11 }
 0x36d   : > { %v1556_v58 = vpop.permute.xlu0 %1555 }
 0x36e   : > { %v1605_v13 = vmul.f32 %v1556_v58, %v1477_v22 }
 0x370   : > { %1621 = vst.msk [vmem:[%s2815_s29 + $0x38] sm:$0xff] %vm326_vm0, %v1605_v13 }
 0x371   : > { %v1561_v15 = vpop.permute.xlu1 %1560 }
 0x372   : > { %v1606_v27 = vmul.f32 %v1561_v15, %v1478_v6 }
 0x374   : > { %1622 = vst.msk [vmem:[%s2815_s29 + $0x40] sm:$0xff] %vm326_vm0, %v1606_v27 }
 0x375   : > { %v1566_v43 = vpop.permute.xlu0 %1565 }
 0x376   : > { %v1607_v28 = vmul.f32 %v1566_v43, %v1479_v42 }
 0x378   : > { %1623 = vst.msk [vmem:[%s2815_s29 + $0x48] sm:$0xff] %vm326_vm0, %v1607_v28 }
 0x379   : > { %v1571_v1 = vpop.permute.xlu1 %1570 }
 0x37a   : > { %v1608_v2 = vmul.f32 %v1571_v1, %v1480_v35 }
 0x37c   : > { %1624 = vst.msk [vmem:[%s2815_s29 + $0x50] sm:$0xff] %vm326_vm0, %v1608_v2 }
 0x37d   : > { %v1576_v44 = vpop.permute.xlu0 %1575 }
 0x37e   : > { %v1609_v45 = vmul.f32 %v1576_v44, %v1481_v24 }
 0x380   : > { %1625 = vst.msk [vmem:[%s2815_s29 + $0x58] sm:$0xff] %vm326_vm0, %v1609_v45 }
 0x381   : > { %v1581_v17 = vpop.permute.xlu1 %1580 }
 0x382   : > { %v1610_v30 = vmul.f32 %v1581_v17, %v1482_v46 }
 0x384   : > { %1626 = vst.msk [vmem:[%s2815_s29 + $0x60] sm:$0xff] %vm326_vm0, %v1610_v30 }
 0x385   : > { %v1586_v18 = vpop.permute.xlu0 %1585 }
 0x386   : > { %v1611_v33 = vmul.f32 %v1586_v18, %v1483_v31 }
 0x388   : > { %1627 = vst.msk [vmem:[%s2815_s29 + $0x68] sm:$0xff] %vm326_vm0, %v1611_v33 }
 0x38a   : > { %v1591_v4 = vpop.permute.xlu1 %1590 }
 0x38b   : > { %v1612_v7 = vmul.f32 %v1591_v4, %v1484_v34 }
 0x38d   : > { %1628 = vst.msk [vmem:[%s2815_s29 + $0x70] sm:$0xff] %vm326_vm0, %v1612_v7 }
 0x38e   : > { %v1596_v21 = vpop.permute.xlu0 %1595 }
 0x38f   : > { %v1613_v57 = vmul.f32 %v1596_v21, %v1485_v20 }
 0x391   : > { %1629 = vst.msk [vmem:[%s2815_s29 + $0x78] sm:$0xff] %vm326_vm0, %v1613_v57 }
 0x392 PF: > { %s13_s14 = sadd.s32 1, %s2146_s14   ;;  %s2917_s12 = smov %s2142_s13 }
 0x393   : > { %p10_p5 = scmp.ge.s32.totalorder %s13_s14, 6   ;;  %s2918_s13 = smov %s2920_s15 }
 0x395   :  { %12 = sbr.rel (!%p10_p5) target bundleno = 2 (0x2), region = 76 }

</bundles_post_ra>
